<compile_context>
chip_gen: v6e
topology: v6e:2x2x1
jax: 0.10.0
libtpu: 0.0.40
codegen_flags: <defaults>
</compile_context>

<pallas_src>
import functools

import jax
import jax.numpy as jnp
from jax import lax
from jax.experimental import pallas as pl
from jax.experimental.pallas import tpu as pltpu

EPS = 1e-5                    # torch.nn.LayerNorm default
MXU_DTYPE = jnp.bfloat16      # MXU operand dtype (f32 accumulate always requested)
WEIGHT_DTYPE = jnp.bfloat16   # storage dtype of the large weight matrices


# ----------------------------- in-kernel helpers -----------------------------

def _layer_norm(x, gamma, beta):
    mean = jnp.mean(x, axis=-1, keepdims=True)
    var = jnp.mean((x - mean) ** 2, axis=-1, keepdims=True)
    return (x - mean) * lax.rsqrt(var + EPS) * gamma + beta


def _softmax_last(x, approx):
    m = jnp.max(x, axis=-1, keepdims=True)
    e = jnp.exp(x - m)
    return e * pl.reciprocal(jnp.sum(e, axis=-1, keepdims=True), approx=approx)


def _mm(a, b):
    """MXU matmul with f32 accumulation; operands cast to MXU_DTYPE."""
    return jnp.dot(a.astype(MXU_DTYPE), b.astype(MXU_DTYPE),
                   preferred_element_type=jnp.float32)


def _mha(x_q, x_kv, wq, bq, wkv, bk, bv, wo, bo, *, num_heads, dim_q, dim_k):
    """Multi-head attention. wq/bq are pre-scaled by 1/sqrt(dim_q).
    wq: (D, H*dq)   wkv: (D, 2*H*dk) (fused K|V)   wo: (H*dk, D)."""
    hk = num_heads * dim_k
    q = _mm(x_q, wq) + bq                 # (Sq, H*dq)   one fused matmul for all heads
    kv = _mm(x_kv, wkv)                   # (Skv, 2*H*dk) fused K|V projection
    k = kv[:, :hk] + bk
    v = kv[:, hk:] + bv
    ctx = []
    for h in range(num_heads):            # small per-head score/softmax/PV; projections stay fused
        qh = q[:, h * dim_q:(h + 1) * dim_q]
        kh = k[:, h * dim_k:(h + 1) * dim_k]
        vh = v[:, h * dim_k:(h + 1) * dim_k]
        s = lax.dot_general(qh.astype(MXU_DTYPE), kh.astype(MXU_DTYPE),
                            (((1,), (1,)), ((), ())),
                            preferred_element_type=jnp.float32)      # (Sq, Skv)
        p = _softmax_last(s, approx=True)
        ctx.append(_mm(p, vh))                                       # (Sq, dk)
    ctx = jnp.concatenate(ctx, axis=-1)                              # (Sq, H*dk)
    return _mm(ctx, wo) + bo                                         # single output projection


# -------------------- fused all-layers decoder kernel ------------------------
# grid = (B, L); per-batch activation x lives in a VMEM scratch across the L axis.

def _decoder_kernel(num_heads, dim_q, dim_k, num_layers,
                    tgt_ref, mem_ref, pe_ref,
                    wq1_ref, wkv1_ref, wo1_ref,
                    wq2_ref, wkv2_ref, wo2_ref,
                    w1_ref, w2_ref,
                    vd_ref, vf_ref,
                    wout_ref, bout_ref,
                    out_ref, x_scr):
    l = pl.program_id(1)

    @pl.when(l == 0)
    def _():
        # positional encoding added once, before the first layer
        x_scr[...] = tgt_ref[0].astype(jnp.float32) + pe_ref[0].astype(jnp.float32)

    x = x_scr[...]                         # (Sq, D) f32, resident across layers
    mem = mem_ref[0].astype(jnp.float32)   # (Skv, D)

    # unpack the row-packed small per-layer vectors (all f32)
    vd = vd_ref[0]                         # (16, D)
    vf = vf_ref[0]                         # (8, dim_ff)
    row = lambda i: vd[i:i + 1, :]
    bq1, bk1, bv1, bo1, g1, be1 = [row(i) for i in range(0, 6)]
    bq2, bk2, bv2, bo2, g2, be2 = [row(i) for i in range(6, 12)]
    b2, g3, be3 = [row(i) for i in range(12, 15)]
    b1 = vf[0:1, :]

    # sublayer 1: self-attention -> residual -> LayerNorm  (dropout = identity, eval)
    a = _mha(x, x, wq1_ref[0], bq1, wkv1_ref[0], bk1, bv1, wo1_ref[0], bo1,
             num_heads=num_heads, dim_q=dim_q, dim_k=dim_k)
    x = _layer_norm(x + a, g1, be1)

    # sublayer 2: cross-attention over encoder memory
    a = _mha(x, mem, wq2_ref[0], bq2, wkv2_ref[0], bk2, bv2, wo2_ref[0], bo2,
             num_heads=num_heads, dim_q=dim_q, dim_k=dim_k)
    x = _layer_norm(x + a, g2, be2)

    # sublayer 3: FFN (Linear -> ReLU -> Linear) -> residual -> LayerNorm
    h = jnp.maximum(_mm(x, w1_ref[0]) + b1, 0.0)
    y = _mm(h, w2_ref[0]) + b2
    x = _layer_norm(x + y, g3, be3)

    x_scr[...] = x

    # output head fused into the last layer iteration
    @pl.when(l == num_layers - 1)
    def _():
        logits = _mm(x, wout_ref[...]) + bout_ref[...]
        out_ref[0] = _softmax_last(logits, approx=False).astype(out_ref.dtype)


# --------------------------------- wrappers ----------------------------------

def position_encoding(seq_len, dim_model):
    # Standard sinusoidal encoding used by the tutorial this module comes from.
    pos = jnp.arange(seq_len, dtype=jnp.float32).reshape(1, -1, 1)
    dim = jnp.arange(dim_model, dtype=jnp.float32).reshape(1, 1, -1)
    phase = pos / (1e4 ** (dim / dim_model))
    return jnp.where(dim.astype(jnp.int32) % 2 == 0, jnp.sin(phase), jnp.cos(phase))


def pack_params(params, *, num_heads, dim_q, dim_k, dim_model, dim_ff):
    """Stack per-layer weights on a leading L axis (bf16), fold the attention scale into
    Wq/bq, fuse K|V weights, and row-pack all small vectors into two slabs (f32)."""
    assert num_heads * dim_q == dim_model and num_heads * dim_k == dim_model, \
        "slab packing assumes H*dq == H*dk == dim_model (true for this module)"
    scale = 1.0 / (dim_q ** 0.5)
    layers = params["layers"]

    def stack(fn, dtype=WEIGHT_DTYPE):
        return jnp.stack([fn(lp) for lp in layers]).astype(dtype)

    def vec_d(lp):
        a1, a2, f = lp["attn1"], lp["attn2"], lp["ffn"]
        rows = [a1["bq"] * scale, a1["bk"], a1["bv"], a1["bo"], a1["gamma"], a1["beta"],
                a2["bq"] * scale, a2["bk"], a2["bv"], a2["bo"], a2["gamma"], a2["beta"],
                f["b2"], f["gamma"], f["beta"],
                jnp.zeros((dim_model,), jnp.float32)]          # pad to 16 rows
        return jnp.stack(rows)

    def vec_f(lp):
        return jnp.concatenate([lp["ffn"]["b1"][None, :],
                                jnp.zeros((7, dim_ff), jnp.float32)], axis=0)

    return dict(
        wq1=stack(lambda lp: lp["attn1"]["wq"] * scale),
        wkv1=stack(lambda lp: jnp.concatenate([lp["attn1"]["wk"], lp["attn1"]["wv"]], axis=1)),
        wo1=stack(lambda lp: lp["attn1"]["wo"]),
        wq2=stack(lambda lp: lp["attn2"]["wq"] * scale),
        wkv2=stack(lambda lp: jnp.concatenate([lp["attn2"]["wk"], lp["attn2"]["wv"]], axis=1)),
        wo2=stack(lambda lp: lp["attn2"]["wo"]),
        w1=stack(lambda lp: lp["ffn"]["w1"]),
        w2=stack(lambda lp: lp["ffn"]["w2"]),
        vecD=stack(vec_d, dtype=jnp.float32),
        vecF=stack(vec_f, dtype=jnp.float32),
        wout=params["wout"].astype(WEIGHT_DTYPE),
        bout=params["bout"][None, :].astype(jnp.float32),
    )


_STACKED_KEYS = ("wq1", "wkv1", "wo1", "wq2", "wkv2", "wo2", "w1", "w2", "vecD", "vecF")


def transformer_decoder(tgt, memory, packed, *, num_heads, dim_q, dim_k):
    B, Sq, D = tgt.shape
    _, Skv, _ = memory.shape
    L = packed["wq1"].shape[0]
    F = packed["w1"].shape[-1]

    pe = position_encoding(Sq, D).astype(tgt.dtype)   # (1, Sq, D)

    kernel = functools.partial(_decoder_kernel, num_heads, dim_q, dim_k, L)

    def stacked_spec(a):          # per-layer weights: block index follows l (double-buffered)
        return pl.BlockSpec((1,) + a.shape[1:], lambda b, l: (l, 0, 0))

    def const_spec(a):            # constant over the whole grid: single-buffered
        nd = a.ndim
        return pl.BlockSpec(a.shape, lambda b, l, _nd=nd: (0,) * _nd,
                            pipeline_mode=pl.Buffered(1))

    inputs = [tgt, memory, pe] + [packed[k] for k in _STACKED_KEYS] \
             + [packed["wout"], packed["bout"]]
    in_specs = ([pl.BlockSpec((1, Sq, D), lambda b, l: (b, 0, 0)),
                 pl.BlockSpec((1, Skv, D), lambda b, l: (b, 0, 0)),
                 const_spec(pe)]
                + [stacked_spec(packed[k]) for k in _STACKED_KEYS]
                + [const_spec(packed["wout"]), const_spec(packed["bout"])])

    # ---- explicit VMEM budget (double-buffered per-layer weights + activations) ----
    def nbytes(a):
        return int(a.size) * a.dtype.itemsize
    per_layer_w = sum(nbytes(packed[k]) // L for k in _STACKED_KEYS)
    budget = (2 * per_layer_w                                   # double-buffered layer weights
              + 2 * (Sq + Skv + Sq) * D * tgt.dtype.itemsize    # tgt/memory/out blocks (x2)
              + nbytes(pe) + nbytes(packed["wout"]) + nbytes(packed["bout"])
              + Sq * D * 4                                      # x scratch (f32)
              + Sq * F * 4 + 4 * Sq * max(Sq, Skv) * 4)         # FFN hidden + score working set
    vmem_limit = min(max(int(budget * 1.5) + (8 << 20), 32 << 20), 64 << 20)  # v7x-safe cap

    return pl.pallas_call(
        kernel,
        out_shape=jax.ShapeDtypeStruct((B, Sq, D), tgt.dtype),
        grid=(B, L),
        in_specs=in_specs,
        out_specs=pl.BlockSpec((1, Sq, D), lambda b, l: (b, 0, 0)),
        scratch_shapes=[pltpu.VMEM((Sq, D), jnp.float32)],
        compiler_params=pltpu.CompilerParams(
            dimension_semantics=("parallel", "arbitrary"),
            vmem_limit_bytes=vmem_limit),
    )(*inputs)


# --------------------------- parameter init / reference ----------------------

def init_params(key, num_layers, dim_model, num_heads, dim_q, dim_k, dim_ff):
    keys = jax.random.split(key, num_layers + 1)

    def lin(k, shape, fan_in):
        return jax.random.normal(k, shape, jnp.float32) / jnp.sqrt(fan_in)

    def layer_params(k):
        ks = iter(jax.random.split(k, 20))

        def attn():
            return dict(
                wq=lin(next(ks), (dim_model, num_heads * dim_q), dim_model),
                bq=lin(next(ks), (num_heads * dim_q,), dim_model),
                wk=lin(next(ks), (dim_model, num_heads * dim_k), dim_model),
                bk=lin(next(ks), (num_heads * dim_k,), dim_model),
                wv=lin(next(ks), (dim_model, num_heads * dim_k), dim_model),
                bv=lin(next(ks), (num_heads * dim_k,), dim_model),
                wo=lin(next(ks), (num_heads * dim_k, dim_model), num_heads * dim_k),
                bo=lin(next(ks), (dim_model,), num_heads * dim_k),
                gamma=jnp.ones((dim_model,), jnp.float32),
                beta=jnp.zeros((dim_model,), jnp.float32),
            )

        ffn = dict(
            w1=lin(next(ks), (dim_model, dim_ff), dim_model),
            b1=lin(next(ks), (dim_ff,), dim_model),
            w2=lin(next(ks), (dim_ff, dim_model), dim_ff),
            b2=lin(next(ks), (dim_model,), dim_ff),
            gamma=jnp.ones((dim_model,), jnp.float32),
            beta=jnp.zeros((dim_model,), jnp.float32),
        )
        return dict(attn1=attn(), attn2=attn(), ffn=ffn)

    k1, k2 = jax.random.split(keys[-1])
    return dict(
        layers=[layer_params(k) for k in keys[:-1]],
        wout=lin(k1, (dim_model, dim_model), dim_model),
        bout=lin(k2, (dim_model,), dim_model),
    )


def _ref_mha(x_q, x_kv, p, num_heads, dim_q, dim_k):
    B, Sq, _ = x_q.shape
    Skv = x_kv.shape[1]
    q = (x_q @ p["wq"] + p["bq"]).reshape(B, Sq, num_heads, dim_q)
    k = (x_kv @ p["wk"] + p["bk"]).reshape(B, Skv, num_heads, dim_k)
    v = (x_kv @ p["wv"] + p["bv"]).reshape(B, Skv, num_heads, dim_k)
    s = jnp.einsum("bqhd,bkhd->bhqk", q, k) / (dim_q ** 0.5)
    a = jax.nn.softmax(s, axis=-1)
    ctx = jnp.einsum("bhqk,bkhd->bqhd", a, v).reshape(B, Sq, num_heads * dim_k)
    return ctx @ p["wo"] + p["bo"]


def _ref_res_ln(x, sub, gamma, beta):
    y = x + sub
    mean = y.mean(-1, keepdims=True)
    var = ((y - mean) ** 2).mean(-1, keepdims=True)
    return (y - mean) * lax.rsqrt(var + EPS) * gamma + beta


def ref_decoder(tgt, memory, params, *, num_heads, dim_q, dim_k):
    _, S, D = tgt.shape
    x = tgt + position_encoding(S, D)
    for lp in params["layers"]:
        a1, a2, f = lp["attn1"], lp["attn2"], lp["ffn"]
        x = _ref_res_ln(x, _ref_mha(x, x, a1, num_heads, dim_q, dim_k), a1["gamma"], a1["beta"])
        x = _ref_res_ln(x, _ref_mha(x, memory, a2, num_heads, dim_q, dim_k), a2["gamma"], a2["beta"])
        h = jnp.maximum(x @ f["w1"] + f["b1"], 0.0)
        x = _ref_res_ln(x, h @ f["w2"] + f["b2"], f["gamma"], f["beta"])
    logits = x @ params["wout"] + params["bout"]
    return jax.nn.softmax(logits, axis=-1)


# ----------------------------------- main ------------------------------------

if __name__ == "__main__":
    num_layers = 2
    dim_model = 32
    num_heads = 4
    dim_ff = 64
    dim_q = dim_k = max(dim_model // num_heads, 1)
    batch, seq_tgt, seq_mem = 2, 8, 12

    key = jax.random.PRNGKey(0)
    k_tgt, k_mem, k_par = jax.random.split(key, 3)
    tgt = jax.random.normal(k_tgt, (batch, seq_tgt, dim_model), jnp.float32)
    memory = jax.random.normal(k_mem, (batch, seq_mem, dim_model), jnp.float32)
    params = init_params(k_par, num_layers, dim_model, num_heads, dim_q, dim_k, dim_ff)
    packed = pack_params(params, num_heads=num_heads, dim_q=dim_q, dim_k=dim_k,
                         dim_model=dim_model, dim_ff=dim_ff)

    fwd = jax.jit(functools.partial(transformer_decoder,
                                    num_heads=num_heads, dim_q=dim_q, dim_k=dim_k))
    out = jax.block_until_ready(fwd(tgt, memory, packed))

    ref = ref_decoder(tgt, memory, params, num_heads=num_heads, dim_q=dim_q, dim_k=dim_k)
    assert out.shape == (batch, seq_tgt, dim_model)
    # bf16 MXU operands + approx-reciprocal attention softmax vs an all-f32 reference.
    err = float(jnp.max(jnp.abs(out - ref)))
    assert err < 3e-2, f"mismatch vs pure-JAX reference (max abs err {err})"
    print("KERNEL_OK")
</pallas_src>

<mosaic_0001>
module attributes {stable_mosaic.version = 11 : i64} {
  func.func @_decoder_kernel(%arg0: i32, %arg1: i32, %arg2: memref<1x8x32xf32, #tpu.memory_space<vmem>>, %arg3: memref<1x12x32xf32, #tpu.memory_space<vmem>>, %arg4: memref<1x8x32xf32, #tpu.memory_space<vmem>>, %arg5: memref<1x32x32xbf16, #tpu.memory_space<vmem>>, %arg6: memref<1x32x64xbf16, #tpu.memory_space<vmem>>, %arg7: memref<1x32x32xbf16, #tpu.memory_space<vmem>>, %arg8: memref<1x32x32xbf16, #tpu.memory_space<vmem>>, %arg9: memref<1x32x64xbf16, #tpu.memory_space<vmem>>, %arg10: memref<1x32x32xbf16, #tpu.memory_space<vmem>>, %arg11: memref<1x32x64xbf16, #tpu.memory_space<vmem>>, %arg12: memref<1x64x32xbf16, #tpu.memory_space<vmem>>, %arg13: memref<1x16x32xf32, #tpu.memory_space<vmem>>, %arg14: memref<1x8x64xf32, #tpu.memory_space<vmem>>, %arg15: memref<32x32xbf16, #tpu.memory_space<vmem>>, %arg16: memref<1x32xf32, #tpu.memory_space<vmem>>, %arg17: memref<1x8x32xf32, #tpu.memory_space<vmem>>, %arg18: memref<8x32xf32, #tpu.memory_space<vmem>>) attributes {dimension_semantics = [#tpu.dimension_semantics<parallel>, #tpu.dimension_semantics<arbitrary>], iteration_bounds = array<i64: 2, 2>, scalar_prefetch = 0 : i64, scratch_operands = 1 : i64, tpu.core_type = #tpu.core_type<tc>, window_params = [{transform_indices = @transform_0, window_bounds = array<i64: 1, 8, 32>}, {transform_indices = @transform_1, window_bounds = array<i64: 1, 12, 32>}, {pipeline_mode = #tpu.pipeline_mode<synchronous>, transform_indices = @transform_2, window_bounds = array<i64: 1, 8, 32>}, {transform_indices = @transform_3, window_bounds = array<i64: 1, 32, 32>}, {transform_indices = @transform_4, window_bounds = array<i64: 1, 32, 64>}, {transform_indices = @transform_5, window_bounds = array<i64: 1, 32, 32>}, {transform_indices = @transform_6, window_bounds = array<i64: 1, 32, 32>}, {transform_indices = @transform_7, window_bounds = array<i64: 1, 32, 64>}, {transform_indices = @transform_8, window_bounds = array<i64: 1, 32, 32>}, {transform_indices = @transform_9, window_bounds = array<i64: 1, 32, 64>}, {transform_indices = @transform_10, window_bounds = array<i64: 1, 64, 32>}, {transform_indices = @transform_11, window_bounds = array<i64: 1, 16, 32>}, {transform_indices = @transform_12, window_bounds = array<i64: 1, 8, 64>}, {pipeline_mode = #tpu.pipeline_mode<synchronous>, transform_indices = @transform_13, window_bounds = array<i64: 32, 32>}, {pipeline_mode = #tpu.pipeline_mode<synchronous>, transform_indices = @transform_14, window_bounds = array<i64: 1, 32>}, {transform_indices = @transform_15, window_bounds = array<i64: 1, 8, 32>}]} {
    %c0_i32 = arith.constant 0 : i32
    %0 = arith.cmpi eq, %arg1, %c0_i32 : i32
    %1 = arith.extui %0 : i1 to i32
    %c0_i32_0 = arith.constant 0 : i32
    %2 = arith.cmpi ne, %1, %c0_i32_0 : i32
    scf.if %2 {
      %c0_93 = arith.constant 0 : index
      %c0_94 = arith.constant 0 : index
      %c0_95 = arith.constant 0 : index
      %311 = vector.load %arg2[%c0_93, %c0_94, %c0_95] : memref<1x8x32xf32, #tpu.memory_space<vmem>>, vector<1x8x32xf32>
      %312 = vector.shape_cast %311 : vector<1x8x32xf32> to vector<8x32xf32>
      %c0_96 = arith.constant 0 : index
      %c0_97 = arith.constant 0 : index
      %c0_98 = arith.constant 0 : index
      %313 = vector.load %arg4[%c0_96, %c0_97, %c0_98] : memref<1x8x32xf32, #tpu.memory_space<vmem>>, vector<1x8x32xf32>
      %314 = vector.shape_cast %313 : vector<1x8x32xf32> to vector<8x32xf32>
      %315 = arith.addf %312, %314 : vector<8x32xf32>
      %c0_99 = arith.constant 0 : index
      %c0_100 = arith.constant 0 : index
      %316 = vector.load %arg18[%c0_99, %c0_100] : memref<8x32xf32, #tpu.memory_space<vmem>>, vector<8x32xf32>
      tpu.vector_store %arg18[%c0_99, %c0_100], %315 {strides = array<i32>} : memref<8x32xf32, #tpu.memory_space<vmem>>, vector<8x32xf32>,
    } else {
    }
    %c0 = arith.constant 0 : index
    %c0_1 = arith.constant 0 : index
    %3 = vector.load %arg18[%c0, %c0_1] : memref<8x32xf32, #tpu.memory_space<vmem>>, vector<8x32xf32>
    %c0_2 = arith.constant 0 : index
    %c0_3 = arith.constant 0 : index
    %c0_4 = arith.constant 0 : index
    %4 = vector.load %arg3[%c0_2, %c0_3, %c0_4] : memref<1x12x32xf32, #tpu.memory_space<vmem>>, vector<1x12x32xf32>
    %5 = vector.shape_cast %4 : vector<1x12x32xf32> to vector<12x32xf32>
    %c0_5 = arith.constant 0 : index
    %c0_6 = arith.constant 0 : index
    %c0_7 = arith.constant 0 : index
    %6 = vector.load %arg13[%c0_5, %c0_6, %c0_7] : memref<1x16x32xf32, #tpu.memory_space<vmem>>, vector<1x16x32xf32>
    %7 = vector.shape_cast %6 : vector<1x16x32xf32> to vector<16x32xf32>
    %c0_8 = arith.constant 0 : index
    %c0_9 = arith.constant 0 : index
    %c0_10 = arith.constant 0 : index
    %8 = vector.load %arg14[%c0_8, %c0_9, %c0_10] : memref<1x8x64xf32, #tpu.memory_space<vmem>>, vector<1x8x64xf32>
    %9 = vector.shape_cast %8 : vector<1x8x64xf32> to vector<8x64xf32>
    %10 = vector.extract_strided_slice %7 {offsets = [0, 0], sizes = [1, 32], strides = [1, 1]} : vector<16x32xf32> to vector<1x32xf32>
    %11 = vector.extract_strided_slice %7 {offsets = [1, 0], sizes = [1, 32], strides = [1, 1]} : vector<16x32xf32> to vector<1x32xf32>
    %12 = vector.extract_strided_slice %7 {offsets = [2, 0], sizes = [1, 32], strides = [1, 1]} : vector<16x32xf32> to vector<1x32xf32>
    %13 = vector.extract_strided_slice %7 {offsets = [3, 0], sizes = [1, 32], strides = [1, 1]} : vector<16x32xf32> to vector<1x32xf32>
    %14 = vector.extract_strided_slice %7 {offsets = [4, 0], sizes = [1, 32], strides = [1, 1]} : vector<16x32xf32> to vector<1x32xf32>
    %15 = vector.extract_strided_slice %7 {offsets = [5, 0], sizes = [1, 32], strides = [1, 1]} : vector<16x32xf32> to vector<1x32xf32>
    %16 = vector.extract_strided_slice %7 {offsets = [6, 0], sizes = [1, 32], strides = [1, 1]} : vector<16x32xf32> to vector<1x32xf32>
    %17 = vector.extract_strided_slice %7 {offsets = [7, 0], sizes = [1, 32], strides = [1, 1]} : vector<16x32xf32> to vector<1x32xf32>
    %18 = vector.extract_strided_slice %7 {offsets = [8, 0], sizes = [1, 32], strides = [1, 1]} : vector<16x32xf32> to vector<1x32xf32>
    %19 = vector.extract_strided_slice %7 {offsets = [9, 0], sizes = [1, 32], strides = [1, 1]} : vector<16x32xf32> to vector<1x32xf32>
    %20 = vector.extract_strided_slice %7 {offsets = [10, 0], sizes = [1, 32], strides = [1, 1]} : vector<16x32xf32> to vector<1x32xf32>
    %21 = vector.extract_strided_slice %7 {offsets = [11, 0], sizes = [1, 32], strides = [1, 1]} : vector<16x32xf32> to vector<1x32xf32>
    %22 = vector.extract_strided_slice %7 {offsets = [12, 0], sizes = [1, 32], strides = [1, 1]} : vector<16x32xf32> to vector<1x32xf32>
    %23 = vector.extract_strided_slice %7 {offsets = [13, 0], sizes = [1, 32], strides = [1, 1]} : vector<16x32xf32> to vector<1x32xf32>
    %24 = vector.extract_strided_slice %7 {offsets = [14, 0], sizes = [1, 32], strides = [1, 1]} : vector<16x32xf32> to vector<1x32xf32>
    %25 = vector.extract_strided_slice %9 {offsets = [0, 0], sizes = [1, 64], strides = [1, 1]} : vector<8x64xf32> to vector<1x64xf32>
    %c0_11 = arith.constant 0 : index
    %c0_12 = arith.constant 0 : index
    %c0_13 = arith.constant 0 : index
    %26 = vector.load %arg5[%c0_11, %c0_12, %c0_13] : memref<1x32x32xbf16, #tpu.memory_space<vmem>>, vector<1x32x32xbf16>
    %27 = vector.shape_cast %26 : vector<1x32x32xbf16> to vector<32x32xbf16>
    %c0_14 = arith.constant 0 : index
    %c0_15 = arith.constant 0 : index
    %c0_16 = arith.constant 0 : index
    %28 = vector.load %arg6[%c0_14, %c0_15, %c0_16] : memref<1x32x64xbf16, #tpu.memory_space<vmem>>, vector<1x32x64xbf16>
    %29 = vector.shape_cast %28 : vector<1x32x64xbf16> to vector<32x64xbf16>
    %c0_17 = arith.constant 0 : index
    %c0_18 = arith.constant 0 : index
    %c0_19 = arith.constant 0 : index
    %30 = vector.load %arg7[%c0_17, %c0_18, %c0_19] : memref<1x32x32xbf16, #tpu.memory_space<vmem>>, vector<1x32x32xbf16>
    %31 = vector.shape_cast %30 : vector<1x32x32xbf16> to vector<32x32xbf16>
    %32 = arith.truncf %3 : vector<8x32xf32> to vector<8x32xbf16>
    %cst = arith.constant dense<0.000000e+00> : vector<8x32xf32>
    %33 = tpu.matmul %32, %27, %cst {dimension_numbers = #tpu.dot_dimension_numbers<[1], [0], [0], [1], [0, 0, 1, 1], [], []>} : vector<8x32xbf16>, vector<32x32xbf16>, vector<8x32xf32> -> vector<8x32xf32>
    %34 = vector.broadcast %10 : vector<1x32xf32> to vector<8x32xf32>
    %35 = arith.addf %33, %34 : vector<8x32xf32>
    %36 = arith.truncf %3 : vector<8x32xf32> to vector<8x32xbf16>
    %cst_20 = arith.constant dense<0.000000e+00> : vector<8x64xf32>
    %37 = tpu.matmul %36, %29, %cst_20 {dimension_numbers = #tpu.dot_dimension_numbers<[1], [0], [0], [1], [0, 0, 1, 1], [], []>} : vector<8x32xbf16>, vector<32x64xbf16>, vector<8x64xf32> -> vector<8x64xf32>
    %38 = vector.extract_strided_slice %37 {offsets = [0, 0], sizes = [8, 32], strides = [1, 1]} : vector<8x64xf32> to vector<8x32xf32>
    %39 = vector.broadcast %11 : vector<1x32xf32> to vector<8x32xf32>
    %40 = arith.addf %38, %39 : vector<8x32xf32>
    %41 = vector.extract_strided_slice %37 {offsets = [0, 32], sizes = [8, 32], strides = [1, 1]} : vector<8x64xf32> to vector<8x32xf32>
    %42 = vector.broadcast %12 : vector<1x32xf32> to vector<8x32xf32>
    %43 = arith.addf %41, %42 : vector<8x32xf32>
    %44 = vector.extract_strided_slice %35 {offsets = [0, 0], sizes = [8, 8], strides = [1, 1]} : vector<8x32xf32> to vector<8x8xf32>
    %45 = vector.extract_strided_slice %40 {offsets = [0, 0], sizes = [8, 8], strides = [1, 1]} : vector<8x32xf32> to vector<8x8xf32>
    %46 = vector.extract_strided_slice %43 {offsets = [0, 0], sizes = [8, 8], strides = [1, 1]} : vector<8x32xf32> to vector<8x8xf32>
    %47 = arith.truncf %44 : vector<8x8xf32> to vector<8x8xbf16>
    %48 = arith.truncf %45 : vector<8x8xf32> to vector<8x8xbf16>
    %cst_21 = arith.constant dense<0.000000e+00> : vector<8x8xf32>
    %49 = tpu.matmul %47, %48, %cst_21 {dimension_numbers = #tpu.dot_dimension_numbers<[1], [1], [0], [0], [0, 0, 1, 0], [], []>} : vector<8x8xbf16>, vector<8x8xbf16>, vector<8x8xf32> -> vector<8x8xf32>
    %cst_22 = arith.constant dense<0xFF800000> : vector<8xf32>
    %50 = vector.multi_reduction <maximumf>, %49, %cst_22 [1] : vector<8x8xf32> to vector<8xf32>
    %51 = vector.shape_cast %50 : vector<8xf32> to vector<8x1xf32>
    %52 = vector.broadcast %51 : vector<8x1xf32> to vector<8x8xf32>
    %53 = arith.subf %49, %52 : vector<8x8xf32>
    %54 = math.exp %53 : vector<8x8xf32>
    %cst_23 = arith.constant dense<0.000000e+00> : vector<8xf32>
    %55 = vector.multi_reduction <add>, %54, %cst_23 [1] : vector<8x8xf32> to vector<8xf32>
    %56 = vector.shape_cast %55 : vector<8xf32> to vector<8x1xf32>
    %57 = tpu.reciprocal %56 {approx = true} : vector<8x1xf32> -> vector<8x1xf32>
    %58 = vector.broadcast %57 : vector<8x1xf32> to vector<8x8xf32>
    %59 = arith.mulf %54, %58 : vector<8x8xf32>
    %60 = arith.truncf %59 : vector<8x8xf32> to vector<8x8xbf16>
    %61 = arith.truncf %46 : vector<8x8xf32> to vector<8x8xbf16>
    %cst_24 = arith.constant dense<0.000000e+00> : vector<8x8xf32>
    %62 = tpu.matmul %60, %61, %cst_24 {dimension_numbers = #tpu.dot_dimension_numbers<[1], [0], [0], [1], [0, 0, 1, 1], [], []>} : vector<8x8xbf16>, vector<8x8xbf16>, vector<8x8xf32> -> vector<8x8xf32>
    %63 = vector.extract_strided_slice %35 {offsets = [0, 8], sizes = [8, 8], strides = [1, 1]} : vector<8x32xf32> to vector<8x8xf32>
    %64 = vector.extract_strided_slice %40 {offsets = [0, 8], sizes = [8, 8], strides = [1, 1]} : vector<8x32xf32> to vector<8x8xf32>
    %65 = vector.extract_strided_slice %43 {offsets = [0, 8], sizes = [8, 8], strides = [1, 1]} : vector<8x32xf32> to vector<8x8xf32>
    %66 = arith.truncf %63 : vector<8x8xf32> to vector<8x8xbf16>
    %67 = arith.truncf %64 : vector<8x8xf32> to vector<8x8xbf16>
    %cst_25 = arith.constant dense<0.000000e+00> : vector<8x8xf32>
    %68 = tpu.matmul %66, %67, %cst_25 {dimension_numbers = #tpu.dot_dimension_numbers<[1], [1], [0], [0], [0, 0, 1, 0], [], []>} : vector<8x8xbf16>, vector<8x8xbf16>, vector<8x8xf32> -> vector<8x8xf32>
    %cst_26 = arith.constant dense<0xFF800000> : vector<8xf32>
    %69 = vector.multi_reduction <maximumf>, %68, %cst_26 [1] : vector<8x8xf32> to vector<8xf32>
    %70 = vector.shape_cast %69 : vector<8xf32> to vector<8x1xf32>
    %71 = vector.broadcast %70 : vector<8x1xf32> to vector<8x8xf32>
    %72 = arith.subf %68, %71 : vector<8x8xf32>
    %73 = math.exp %72 : vector<8x8xf32>
    %cst_27 = arith.constant dense<0.000000e+00> : vector<8xf32>
    %74 = vector.multi_reduction <add>, %73, %cst_27 [1] : vector<8x8xf32> to vector<8xf32>
    %75 = vector.shape_cast %74 : vector<8xf32> to vector<8x1xf32>
    %76 = tpu.reciprocal %75 {approx = true} : vector<8x1xf32> -> vector<8x1xf32>
    %77 = vector.broadcast %76 : vector<8x1xf32> to vector<8x8xf32>
    %78 = arith.mulf %73, %77 : vector<8x8xf32>
    %79 = arith.truncf %78 : vector<8x8xf32> to vector<8x8xbf16>
    %80 = arith.truncf %65 : vector<8x8xf32> to vector<8x8xbf16>
    %cst_28 = arith.constant dense<0.000000e+00> : vector<8x8xf32>
    %81 = tpu.matmul %79, %80, %cst_28 {dimension_numbers = #tpu.dot_dimension_numbers<[1], [0], [0], [1], [0, 0, 1, 1], [], []>} : vector<8x8xbf16>, vector<8x8xbf16>, vector<8x8xf32> -> vector<8x8xf32>
    %82 = vector.extract_strided_slice %35 {offsets = [0, 16], sizes = [8, 8], strides = [1, 1]} : vector<8x32xf32> to vector<8x8xf32>
    %83 = vector.extract_strided_slice %40 {offsets = [0, 16], sizes = [8, 8], strides = [1, 1]} : vector<8x32xf32> to vector<8x8xf32>
    %84 = vector.extract_strided_slice %43 {offsets = [0, 16], sizes = [8, 8], strides = [1, 1]} : vector<8x32xf32> to vector<8x8xf32>
    %85 = arith.truncf %82 : vector<8x8xf32> to vector<8x8xbf16>
    %86 = arith.truncf %83 : vector<8x8xf32> to vector<8x8xbf16>
    %cst_29 = arith.constant dense<0.000000e+00> : vector<8x8xf32>
    %87 = tpu.matmul %85, %86, %cst_29 {dimension_numbers = #tpu.dot_dimension_numbers<[1], [1], [0], [0], [0, 0, 1, 0], [], []>} : vector<8x8xbf16>, vector<8x8xbf16>, vector<8x8xf32> -> vector<8x8xf32>
    %cst_30 = arith.constant dense<0xFF800000> : vector<8xf32>
    %88 = vector.multi_reduction <maximumf>, %87, %cst_30 [1] : vector<8x8xf32> to vector<8xf32>
    %89 = vector.shape_cast %88 : vector<8xf32> to vector<8x1xf32>
    %90 = vector.broadcast %89 : vector<8x1xf32> to vector<8x8xf32>
    %91 = arith.subf %87, %90 : vector<8x8xf32>
    %92 = math.exp %91 : vector<8x8xf32>
    %cst_31 = arith.constant dense<0.000000e+00> : vector<8xf32>
    %93 = vector.multi_reduction <add>, %92, %cst_31 [1] : vector<8x8xf32> to vector<8xf32>
    %94 = vector.shape_cast %93 : vector<8xf32> to vector<8x1xf32>
    %95 = tpu.reciprocal %94 {approx = true} : vector<8x1xf32> -> vector<8x1xf32>
    %96 = vector.broadcast %95 : vector<8x1xf32> to vector<8x8xf32>
    %97 = arith.mulf %92, %96 : vector<8x8xf32>
    %98 = arith.truncf %97 : vector<8x8xf32> to vector<8x8xbf16>
    %99 = arith.truncf %84 : vector<8x8xf32> to vector<8x8xbf16>
    %cst_32 = arith.constant dense<0.000000e+00> : vector<8x8xf32>
    %100 = tpu.matmul %98, %99, %cst_32 {dimension_numbers = #tpu.dot_dimension_numbers<[1], [0], [0], [1], [0, 0, 1, 1], [], []>} : vector<8x8xbf16>, vector<8x8xbf16>, vector<8x8xf32> -> vector<8x8xf32>
    %101 = vector.extract_strided_slice %35 {offsets = [0, 24], sizes = [8, 8], strides = [1, 1]} : vector<8x32xf32> to vector<8x8xf32>
    %102 = vector.extract_strided_slice %40 {offsets = [0, 24], sizes = [8, 8], strides = [1, 1]} : vector<8x32xf32> to vector<8x8xf32>
    %103 = vector.extract_strided_slice %43 {offsets = [0, 24], sizes = [8, 8], strides = [1, 1]} : vector<8x32xf32> to vector<8x8xf32>
    %104 = arith.truncf %101 : vector<8x8xf32> to vector<8x8xbf16>
    %105 = arith.truncf %102 : vector<8x8xf32> to vector<8x8xbf16>
    %cst_33 = arith.constant dense<0.000000e+00> : vector<8x8xf32>
    %106 = tpu.matmul %104, %105, %cst_33 {dimension_numbers = #tpu.dot_dimension_numbers<[1], [1], [0], [0], [0, 0, 1, 0], [], []>} : vector<8x8xbf16>, vector<8x8xbf16>, vector<8x8xf32> -> vector<8x8xf32>
    %cst_34 = arith.constant dense<0xFF800000> : vector<8xf32>
    %107 = vector.multi_reduction <maximumf>, %106, %cst_34 [1] : vector<8x8xf32> to vector<8xf32>
    %108 = vector.shape_cast %107 : vector<8xf32> to vector<8x1xf32>
    %109 = vector.broadcast %108 : vector<8x1xf32> to vector<8x8xf32>
    %110 = arith.subf %106, %109 : vector<8x8xf32>
    %111 = math.exp %110 : vector<8x8xf32>
    %cst_35 = arith.constant dense<0.000000e+00> : vector<8xf32>
    %112 = vector.multi_reduction <add>, %111, %cst_35 [1] : vector<8x8xf32> to vector<8xf32>
    %113 = vector.shape_cast %112 : vector<8xf32> to vector<8x1xf32>
    %114 = tpu.reciprocal %113 {approx = true} : vector<8x1xf32> -> vector<8x1xf32>
    %115 = vector.broadcast %114 : vector<8x1xf32> to vector<8x8xf32>
    %116 = arith.mulf %111, %115 : vector<8x8xf32>
    %117 = arith.truncf %116 : vector<8x8xf32> to vector<8x8xbf16>
    %118 = arith.truncf %103 : vector<8x8xf32> to vector<8x8xbf16>
    %cst_36 = arith.constant dense<0.000000e+00> : vector<8x8xf32>
    %119 = tpu.matmul %117, %118, %cst_36 {dimension_numbers = #tpu.dot_dimension_numbers<[1], [0], [0], [1], [0, 0, 1, 1], [], []>} : vector<8x8xbf16>, vector<8x8xbf16>, vector<8x8xf32> -> vector<8x8xf32>
    %120 = tpu.concatenate %62, %81, %100, %119 in 1 : vector<8x8xf32>, vector<8x8xf32>, vector<8x8xf32>, vector<8x8xf32> -> vector<8x32xf32>
    %121 = arith.truncf %120 : vector<8x32xf32> to vector<8x32xbf16>
    %cst_37 = arith.constant dense<0.000000e+00> : vector<8x32xf32>
    %122 = tpu.matmul %121, %31, %cst_37 {dimension_numbers = #tpu.dot_dimension_numbers<[1], [0], [0], [1], [0, 0, 1, 1], [], []>} : vector<8x32xbf16>, vector<32x32xbf16>, vector<8x32xf32> -> vector<8x32xf32>
    %123 = vector.broadcast %13 : vector<1x32xf32> to vector<8x32xf32>
    %124 = arith.addf %122, %123 : vector<8x32xf32>
    %125 = arith.addf %3, %124 : vector<8x32xf32>
    %cst_38 = arith.constant dense<0.000000e+00> : vector<8xf32>
    %126 = vector.multi_reduction <add>, %125, %cst_38 [1] : vector<8x32xf32> to vector<8xf32>
    %127 = vector.shape_cast %126 : vector<8xf32> to vector<8x1xf32>
    %cst_39 = arith.constant 3.200000e+01 : f32
    %128 = vector.broadcast %cst_39 : f32 to vector<8x1xf32>
    %129 = arith.divf %127, %128 : vector<8x1xf32>
    %130 = vector.broadcast %129 : vector<8x1xf32> to vector<8x32xf32>
    %131 = arith.subf %125, %130 : vector<8x32xf32>
    %132 = arith.mulf %131, %131 : vector<8x32xf32>
    %cst_40 = arith.constant dense<0.000000e+00> : vector<8xf32>
    %133 = vector.multi_reduction <add>, %132, %cst_40 [1] : vector<8x32xf32> to vector<8xf32>
    %134 = vector.shape_cast %133 : vector<8xf32> to vector<8x1xf32>
    %cst_41 = arith.constant 3.200000e+01 : f32
    %135 = vector.broadcast %cst_41 : f32 to vector<8x1xf32>
    %136 = arith.divf %134, %135 : vector<8x1xf32>
    %137 = vector.broadcast %129 : vector<8x1xf32> to vector<8x32xf32>
    %138 = arith.subf %125, %137 : vector<8x32xf32>
    %cst_42 = arith.constant 9.99999974E-6 : f32
    %139 = vector.broadcast %cst_42 : f32 to vector<8x1xf32>
    %140 = arith.addf %136, %139 : vector<8x1xf32>
    %141 = math.rsqrt %140 : vector<8x1xf32>
    %142 = vector.broadcast %141 : vector<8x1xf32> to vector<8x32xf32>
    %143 = arith.mulf %138, %142 : vector<8x32xf32>
    %144 = vector.broadcast %14 : vector<1x32xf32> to vector<8x32xf32>
    %145 = arith.mulf %143, %144 : vector<8x32xf32>
    %146 = vector.broadcast %15 : vector<1x32xf32> to vector<8x32xf32>
    %147 = arith.addf %145, %146 : vector<8x32xf32>
    %c0_43 = arith.constant 0 : index
    %c0_44 = arith.constant 0 : index
    %c0_45 = arith.constant 0 : index
    %148 = vector.load %arg8[%c0_43, %c0_44, %c0_45] : memref<1x32x32xbf16, #tpu.memory_space<vmem>>, vector<1x32x32xbf16>
    %149 = vector.shape_cast %148 : vector<1x32x32xbf16> to vector<32x32xbf16>
    %c0_46 = arith.constant 0 : index
    %c0_47 = arith.constant 0 : index
    %c0_48 = arith.constant 0 : index
    %150 = vector.load %arg9[%c0_46, %c0_47, %c0_48] : memref<1x32x64xbf16, #tpu.memory_space<vmem>>, vector<1x32x64xbf16>
    %151 = vector.shape_cast %150 : vector<1x32x64xbf16> to vector<32x64xbf16>
    %c0_49 = arith.constant 0 : index
    %c0_50 = arith.constant 0 : index
    %c0_51 = arith.constant 0 : index
    %152 = vector.load %arg10[%c0_49, %c0_50, %c0_51] : memref<1x32x32xbf16, #tpu.memory_space<vmem>>, vector<1x32x32xbf16>
    %153 = vector.shape_cast %152 : vector<1x32x32xbf16> to vector<32x32xbf16>
    %154 = arith.truncf %147 : vector<8x32xf32> to vector<8x32xbf16>
    %cst_52 = arith.constant dense<0.000000e+00> : vector<8x32xf32>
    %155 = tpu.matmul %154, %149, %cst_52 {dimension_numbers = #tpu.dot_dimension_numbers<[1], [0], [0], [1], [0, 0, 1, 1], [], []>} : vector<8x32xbf16>, vector<32x32xbf16>, vector<8x32xf32> -> vector<8x32xf32>
    %156 = vector.broadcast %16 : vector<1x32xf32> to vector<8x32xf32>
    %157 = arith.addf %155, %156 : vector<8x32xf32>
    %158 = arith.truncf %5 : vector<12x32xf32> to vector<12x32xbf16>
    %cst_53 = arith.constant dense<0.000000e+00> : vector<12x64xf32>
    %159 = tpu.matmul %158, %151, %cst_53 {dimension_numbers = #tpu.dot_dimension_numbers<[1], [0], [0], [1], [0, 0, 1, 1], [], []>} : vector<12x32xbf16>, vector<32x64xbf16>, vector<12x64xf32> -> vector<12x64xf32>
    %160 = vector.extract_strided_slice %159 {offsets = [0, 0], sizes = [12, 32], strides = [1, 1]} : vector<12x64xf32> to vector<12x32xf32>
    %161 = vector.broadcast %17 : vector<1x32xf32> to vector<12x32xf32>
    %162 = arith.addf %160, %161 : vector<12x32xf32>
    %163 = vector.extract_strided_slice %159 {offsets = [0, 32], sizes = [12, 32], strides = [1, 1]} : vector<12x64xf32> to vector<12x32xf32>
    %164 = vector.broadcast %18 : vector<1x32xf32> to vector<12x32xf32>
    %165 = arith.addf %163, %164 : vector<12x32xf32>
    %166 = vector.extract_strided_slice %157 {offsets = [0, 0], sizes = [8, 8], strides = [1, 1]} : vector<8x32xf32> to vector<8x8xf32>
    %167 = vector.extract_strided_slice %162 {offsets = [0, 0], sizes = [12, 8], strides = [1, 1]} : vector<12x32xf32> to vector<12x8xf32>
    %168 = vector.extract_strided_slice %165 {offsets = [0, 0], sizes = [12, 8], strides = [1, 1]} : vector<12x32xf32> to vector<12x8xf32>
    %169 = arith.truncf %166 : vector<8x8xf32> to vector<8x8xbf16>
    %170 = arith.truncf %167 : vector<12x8xf32> to vector<12x8xbf16>
    %cst_54 = arith.constant dense<0.000000e+00> : vector<8x12xf32>
    %171 = tpu.matmul %169, %170, %cst_54 {dimension_numbers = #tpu.dot_dimension_numbers<[1], [1], [0], [0], [0, 0, 1, 0], [], []>} : vector<8x8xbf16>, vector<12x8xbf16>, vector<8x12xf32> -> vector<8x12xf32>
    %cst_55 = arith.constant dense<0xFF800000> : vector<8xf32>
    %172 = vector.multi_reduction <maximumf>, %171, %cst_55 [1] : vector<8x12xf32> to vector<8xf32>
    %173 = vector.shape_cast %172 : vector<8xf32> to vector<8x1xf32>
    %174 = vector.broadcast %173 : vector<8x1xf32> to vector<8x12xf32>
    %175 = arith.subf %171, %174 : vector<8x12xf32>
    %176 = math.exp %175 : vector<8x12xf32>
    %cst_56 = arith.constant dense<0.000000e+00> : vector<8xf32>
    %177 = vector.multi_reduction <add>, %176, %cst_56 [1] : vector<8x12xf32> to vector<8xf32>
    %178 = vector.shape_cast %177 : vector<8xf32> to vector<8x1xf32>
    %179 = tpu.reciprocal %178 {approx = true} : vector<8x1xf32> -> vector<8x1xf32>
    %180 = vector.broadcast %179 : vector<8x1xf32> to vector<8x12xf32>
    %181 = arith.mulf %176, %180 : vector<8x12xf32>
    %182 = arith.truncf %181 : vector<8x12xf32> to vector<8x12xbf16>
    %183 = arith.truncf %168 : vector<12x8xf32> to vector<12x8xbf16>
    %cst_57 = arith.constant dense<0.000000e+00> : vector<8x8xf32>
    %184 = tpu.matmul %182, %183, %cst_57 {dimension_numbers = #tpu.dot_dimension_numbers<[1], [0], [0], [1], [0, 0, 1, 1], [], []>} : vector<8x12xbf16>, vector<12x8xbf16>, vector<8x8xf32> -> vector<8x8xf32>
    %185 = vector.extract_strided_slice %157 {offsets = [0, 8], sizes = [8, 8], strides = [1, 1]} : vector<8x32xf32> to vector<8x8xf32>
    %186 = vector.extract_strided_slice %162 {offsets = [0, 8], sizes = [12, 8], strides = [1, 1]} : vector<12x32xf32> to vector<12x8xf32>
    %187 = vector.extract_strided_slice %165 {offsets = [0, 8], sizes = [12, 8], strides = [1, 1]} : vector<12x32xf32> to vector<12x8xf32>
    %188 = arith.truncf %185 : vector<8x8xf32> to vector<8x8xbf16>
    %189 = arith.truncf %186 : vector<12x8xf32> to vector<12x8xbf16>
    %cst_58 = arith.constant dense<0.000000e+00> : vector<8x12xf32>
    %190 = tpu.matmul %188, %189, %cst_58 {dimension_numbers = #tpu.dot_dimension_numbers<[1], [1], [0], [0], [0, 0, 1, 0], [], []>} : vector<8x8xbf16>, vector<12x8xbf16>, vector<8x12xf32> -> vector<8x12xf32>
    %cst_59 = arith.constant dense<0xFF800000> : vector<8xf32>
    %191 = vector.multi_reduction <maximumf>, %190, %cst_59 [1] : vector<8x12xf32> to vector<8xf32>
    %192 = vector.shape_cast %191 : vector<8xf32> to vector<8x1xf32>
    %193 = vector.broadcast %192 : vector<8x1xf32> to vector<8x12xf32>
    %194 = arith.subf %190, %193 : vector<8x12xf32>
    %195 = math.exp %194 : vector<8x12xf32>
    %cst_60 = arith.constant dense<0.000000e+00> : vector<8xf32>
    %196 = vector.multi_reduction <add>, %195, %cst_60 [1] : vector<8x12xf32> to vector<8xf32>
    %197 = vector.shape_cast %196 : vector<8xf32> to vector<8x1xf32>
    %198 = tpu.reciprocal %197 {approx = true} : vector<8x1xf32> -> vector<8x1xf32>
    %199 = vector.broadcast %198 : vector<8x1xf32> to vector<8x12xf32>
    %200 = arith.mulf %195, %199 : vector<8x12xf32>
    %201 = arith.truncf %200 : vector<8x12xf32> to vector<8x12xbf16>
    %202 = arith.truncf %187 : vector<12x8xf32> to vector<12x8xbf16>
    %cst_61 = arith.constant dense<0.000000e+00> : vector<8x8xf32>
    %203 = tpu.matmul %201, %202, %cst_61 {dimension_numbers = #tpu.dot_dimension_numbers<[1], [0], [0], [1], [0, 0, 1, 1], [], []>} : vector<8x12xbf16>, vector<12x8xbf16>, vector<8x8xf32> -> vector<8x8xf32>
    %204 = vector.extract_strided_slice %157 {offsets = [0, 16], sizes = [8, 8], strides = [1, 1]} : vector<8x32xf32> to vector<8x8xf32>
    %205 = vector.extract_strided_slice %162 {offsets = [0, 16], sizes = [12, 8], strides = [1, 1]} : vector<12x32xf32> to vector<12x8xf32>
    %206 = vector.extract_strided_slice %165 {offsets = [0, 16], sizes = [12, 8], strides = [1, 1]} : vector<12x32xf32> to vector<12x8xf32>
    %207 = arith.truncf %204 : vector<8x8xf32> to vector<8x8xbf16>
    %208 = arith.truncf %205 : vector<12x8xf32> to vector<12x8xbf16>
    %cst_62 = arith.constant dense<0.000000e+00> : vector<8x12xf32>
    %209 = tpu.matmul %207, %208, %cst_62 {dimension_numbers = #tpu.dot_dimension_numbers<[1], [1], [0], [0], [0, 0, 1, 0], [], []>} : vector<8x8xbf16>, vector<12x8xbf16>, vector<8x12xf32> -> vector<8x12xf32>
    %cst_63 = arith.constant dense<0xFF800000> : vector<8xf32>
    %210 = vector.multi_reduction <maximumf>, %209, %cst_63 [1] : vector<8x12xf32> to vector<8xf32>
    %211 = vector.shape_cast %210 : vector<8xf32> to vector<8x1xf32>
    %212 = vector.broadcast %211 : vector<8x1xf32> to vector<8x12xf32>
    %213 = arith.subf %209, %212 : vector<8x12xf32>
    %214 = math.exp %213 : vector<8x12xf32>
    %cst_64 = arith.constant dense<0.000000e+00> : vector<8xf32>
    %215 = vector.multi_reduction <add>, %214, %cst_64 [1] : vector<8x12xf32> to vector<8xf32>
    %216 = vector.shape_cast %215 : vector<8xf32> to vector<8x1xf32>
    %217 = tpu.reciprocal %216 {approx = true} : vector<8x1xf32> -> vector<8x1xf32>
    %218 = vector.broadcast %217 : vector<8x1xf32> to vector<8x12xf32>
    %219 = arith.mulf %214, %218 : vector<8x12xf32>
    %220 = arith.truncf %219 : vector<8x12xf32> to vector<8x12xbf16>
    %221 = arith.truncf %206 : vector<12x8xf32> to vector<12x8xbf16>
    %cst_65 = arith.constant dense<0.000000e+00> : vector<8x8xf32>
    %222 = tpu.matmul %220, %221, %cst_65 {dimension_numbers = #tpu.dot_dimension_numbers<[1], [0], [0], [1], [0, 0, 1, 1], [], []>} : vector<8x12xbf16>, vector<12x8xbf16>, vector<8x8xf32> -> vector<8x8xf32>
    %223 = vector.extract_strided_slice %157 {offsets = [0, 24], sizes = [8, 8], strides = [1, 1]} : vector<8x32xf32> to vector<8x8xf32>
    %224 = vector.extract_strided_slice %162 {offsets = [0, 24], sizes = [12, 8], strides = [1, 1]} : vector<12x32xf32> to vector<12x8xf32>
    %225 = vector.extract_strided_slice %165 {offsets = [0, 24], sizes = [12, 8], strides = [1, 1]} : vector<12x32xf32> to vector<12x8xf32>
    %226 = arith.truncf %223 : vector<8x8xf32> to vector<8x8xbf16>
    %227 = arith.truncf %224 : vector<12x8xf32> to vector<12x8xbf16>
    %cst_66 = arith.constant dense<0.000000e+00> : vector<8x12xf32>
    %228 = tpu.matmul %226, %227, %cst_66 {dimension_numbers = #tpu.dot_dimension_numbers<[1], [1], [0], [0], [0, 0, 1, 0], [], []>} : vector<8x8xbf16>, vector<12x8xbf16>, vector<8x12xf32> -> vector<8x12xf32>
    %cst_67 = arith.constant dense<0xFF800000> : vector<8xf32>
    %229 = vector.multi_reduction <maximumf>, %228, %cst_67 [1] : vector<8x12xf32> to vector<8xf32>
    %230 = vector.shape_cast %229 : vector<8xf32> to vector<8x1xf32>
    %231 = vector.broadcast %230 : vector<8x1xf32> to vector<8x12xf32>
    %232 = arith.subf %228, %231 : vector<8x12xf32>
    %233 = math.exp %232 : vector<8x12xf32>
    %cst_68 = arith.constant dense<0.000000e+00> : vector<8xf32>
    %234 = vector.multi_reduction <add>, %233, %cst_68 [1] : vector<8x12xf32> to vector<8xf32>
    %235 = vector.shape_cast %234 : vector<8xf32> to vector<8x1xf32>
    %236 = tpu.reciprocal %235 {approx = true} : vector<8x1xf32> -> vector<8x1xf32>
    %237 = vector.broadcast %236 : vector<8x1xf32> to vector<8x12xf32>
    %238 = arith.mulf %233, %237 : vector<8x12xf32>
    %239 = arith.truncf %238 : vector<8x12xf32> to vector<8x12xbf16>
    %240 = arith.truncf %225 : vector<12x8xf32> to vector<12x8xbf16>
    %cst_69 = arith.constant dense<0.000000e+00> : vector<8x8xf32>
    %241 = tpu.matmul %239, %240, %cst_69 {dimension_numbers = #tpu.dot_dimension_numbers<[1], [0], [0], [1], [0, 0, 1, 1], [], []>} : vector<8x12xbf16>, vector<12x8xbf16>, vector<8x8xf32> -> vector<8x8xf32>
    %242 = tpu.concatenate %184, %203, %222, %241 in 1 : vector<8x8xf32>, vector<8x8xf32>, vector<8x8xf32>, vector<8x8xf32> -> vector<8x32xf32>
    %243 = arith.truncf %242 : vector<8x32xf32> to vector<8x32xbf16>
    %cst_70 = arith.constant dense<0.000000e+00> : vector<8x32xf32>
    %244 = tpu.matmul %243, %153, %cst_70 {dimension_numbers = #tpu.dot_dimension_numbers<[1], [0], [0], [1], [0, 0, 1, 1], [], []>} : vector<8x32xbf16>, vector<32x32xbf16>, vector<8x32xf32> -> vector<8x32xf32>
    %245 = vector.broadcast %19 : vector<1x32xf32> to vector<8x32xf32>
    %246 = arith.addf %244, %245 : vector<8x32xf32>
    %247 = arith.addf %147, %246 : vector<8x32xf32>
    %cst_71 = arith.constant dense<0.000000e+00> : vector<8xf32>
    %248 = vector.multi_reduction <add>, %247, %cst_71 [1] : vector<8x32xf32> to vector<8xf32>
    %249 = vector.shape_cast %248 : vector<8xf32> to vector<8x1xf32>
    %cst_72 = arith.constant 3.200000e+01 : f32
    %250 = vector.broadcast %cst_72 : f32 to vector<8x1xf32>
    %251 = arith.divf %249, %250 : vector<8x1xf32>
    %252 = vector.broadcast %251 : vector<8x1xf32> to vector<8x32xf32>
    %253 = arith.subf %247, %252 : vector<8x32xf32>
    %254 = arith.mulf %253, %253 : vector<8x32xf32>
    %cst_73 = arith.constant dense<0.000000e+00> : vector<8xf32>
    %255 = vector.multi_reduction <add>, %254, %cst_73 [1] : vector<8x32xf32> to vector<8xf32>
    %256 = vector.shape_cast %255 : vector<8xf32> to vector<8x1xf32>
    %cst_74 = arith.constant 3.200000e+01 : f32
    %257 = vector.broadcast %cst_74 : f32 to vector<8x1xf32>
    %258 = arith.divf %256, %257 : vector<8x1xf32>
    %259 = vector.broadcast %251 : vector<8x1xf32> to vector<8x32xf32>
    %260 = arith.subf %247, %259 : vector<8x32xf32>
    %cst_75 = arith.constant 9.99999974E-6 : f32
    %261 = vector.broadcast %cst_75 : f32 to vector<8x1xf32>
    %262 = arith.addf %258, %261 : vector<8x1xf32>
    %263 = math.rsqrt %262 : vector<8x1xf32>
    %264 = vector.broadcast %263 : vector<8x1xf32> to vector<8x32xf32>
    %265 = arith.mulf %260, %264 : vector<8x32xf32>
    %266 = vector.broadcast %20 : vector<1x32xf32> to vector<8x32xf32>
    %267 = arith.mulf %265, %266 : vector<8x32xf32>
    %268 = vector.broadcast %21 : vector<1x32xf32> to vector<8x32xf32>
    %269 = arith.addf %267, %268 : vector<8x32xf32>
    %c0_76 = arith.constant 0 : index
    %c0_77 = arith.constant 0 : index
    %c0_78 = arith.constant 0 : index
    %270 = vector.load %arg11[%c0_76, %c0_77, %c0_78] : memref<1x32x64xbf16, #tpu.memory_space<vmem>>, vector<1x32x64xbf16>
    %271 = vector.shape_cast %270 : vector<1x32x64xbf16> to vector<32x64xbf16>
    %272 = arith.truncf %269 : vector<8x32xf32> to vector<8x32xbf16>
    %cst_79 = arith.constant dense<0.000000e+00> : vector<8x64xf32>
    %273 = tpu.matmul %272, %271, %cst_79 {dimension_numbers = #tpu.dot_dimension_numbers<[1], [0], [0], [1], [0, 0, 1, 1], [], []>} : vector<8x32xbf16>, vector<32x64xbf16>, vector<8x64xf32> -> vector<8x64xf32>
    %274 = vector.broadcast %25 : vector<1x64xf32> to vector<8x64xf32>
    %275 = arith.addf %273, %274 : vector<8x64xf32>
    %cst_80 = arith.constant 0.000000e+00 : f32
    %276 = vector.broadcast %cst_80 : f32 to vector<8x64xf32>
    %277 = arith.maximumf %275, %276 : vector<8x64xf32>
    %c0_81 = arith.constant 0 : index
    %c0_82 = arith.constant 0 : index
    %c0_83 = arith.constant 0 : index
    %278 = vector.load %arg12[%c0_81, %c0_82, %c0_83] : memref<1x64x32xbf16, #tpu.memory_space<vmem>>, vector<1x64x32xbf16>
    %279 = vector.shape_cast %278 : vector<1x64x32xbf16> to vector<64x32xbf16>
    %280 = arith.truncf %277 : vector<8x64xf32> to vector<8x64xbf16>
    %cst_84 = arith.constant dense<0.000000e+00> : vector<8x32xf32>
    %281 = tpu.matmul %280, %279, %cst_84 {dimension_numbers = #tpu.dot_dimension_numbers<[1], [0], [0], [1], [0, 0, 1, 1], [], []>} : vector<8x64xbf16>, vector<64x32xbf16>, vector<8x32xf32> -> vector<8x32xf32>
    %282 = vector.broadcast %22 : vector<1x32xf32> to vector<8x32xf32>
    %283 = arith.addf %281, %282 : vector<8x32xf32>
    %284 = arith.addf %269, %283 : vector<8x32xf32>
    %cst_85 = arith.constant dense<0.000000e+00> : vector<8xf32>
    %285 = vector.multi_reduction <add>, %284, %cst_85 [1] : vector<8x32xf32> to vector<8xf32>
    %286 = vector.shape_cast %285 : vector<8xf32> to vector<8x1xf32>
    %cst_86 = arith.constant 3.200000e+01 : f32
    %287 = vector.broadcast %cst_86 : f32 to vector<8x1xf32>
    %288 = arith.divf %286, %287 : vector<8x1xf32>
    %289 = vector.broadcast %288 : vector<8x1xf32> to vector<8x32xf32>
    %290 = arith.subf %284, %289 : vector<8x32xf32>
    %291 = arith.mulf %290, %290 : vector<8x32xf32>
    %cst_87 = arith.constant dense<0.000000e+00> : vector<8xf32>
    %292 = vector.multi_reduction <add>, %291, %cst_87 [1] : vector<8x32xf32> to vector<8xf32>
    %293 = vector.shape_cast %292 : vector<8xf32> to vector<8x1xf32>
    %cst_88 = arith.constant 3.200000e+01 : f32
    %294 = vector.broadcast %cst_88 : f32 to vector<8x1xf32>
    %295 = arith.divf %293, %294 : vector<8x1xf32>
    %296 = vector.broadcast %288 : vector<8x1xf32> to vector<8x32xf32>
    %297 = arith.subf %284, %296 : vector<8x32xf32>
    %cst_89 = arith.constant 9.99999974E-6 : f32
    %298 = vector.broadcast %cst_89 : f32 to vector<8x1xf32>
    %299 = arith.addf %295, %298 : vector<8x1xf32>
    %300 = math.rsqrt %299 : vector<8x1xf32>
    %301 = vector.broadcast %300 : vector<8x1xf32> to vector<8x32xf32>
    %302 = arith.mulf %297, %301 : vector<8x32xf32>
    %303 = vector.broadcast %23 : vector<1x32xf32> to vector<8x32xf32>
    %304 = arith.mulf %302, %303 : vector<8x32xf32>
    %305 = vector.broadcast %24 : vector<1x32xf32> to vector<8x32xf32>
    %306 = arith.addf %304, %305 : vector<8x32xf32>
    %c0_90 = arith.constant 0 : index
    %c0_91 = arith.constant 0 : index
    %307 = vector.load %arg18[%c0_90, %c0_91] : memref<8x32xf32, #tpu.memory_space<vmem>>, vector<8x32xf32>
    tpu.vector_store %arg18[%c0_90, %c0_91], %306 {strides = array<i32>} : memref<8x32xf32, #tpu.memory_space<vmem>>, vector<8x32xf32>,
    %c1_i32 = arith.constant 1 : i32
    %308 = arith.cmpi eq, %arg1, %c1_i32 : i32
    %309 = arith.extui %308 : i1 to i32
    %c0_i32_92 = arith.constant 0 : i32
    %310 = arith.cmpi ne, %309, %c0_i32_92 : i32
    scf.if %310 {
      %c0_93 = arith.constant 0 : index
      %c0_94 = arith.constant 0 : index
      %311 = vector.load %arg15[%c0_93, %c0_94] : memref<32x32xbf16, #tpu.memory_space<vmem>>, vector<32x32xbf16>
      %312 = arith.truncf %306 : vector<8x32xf32> to vector<8x32xbf16>
      %cst_95 = arith.constant dense<0.000000e+00> : vector<8x32xf32>
      %313 = tpu.matmul %312, %311, %cst_95 {dimension_numbers = #tpu.dot_dimension_numbers<[1], [0], [0], [1], [0, 0, 1, 1], [], []>} : vector<8x32xbf16>, vector<32x32xbf16>, vector<8x32xf32> -> vector<8x32xf32>
      %c0_96 = arith.constant 0 : index
      %c0_97 = arith.constant 0 : index
      %314 = vector.load %arg16[%c0_96, %c0_97] : memref<1x32xf32, #tpu.memory_space<vmem>>, vector<1x32xf32>
      %315 = vector.broadcast %314 : vector<1x32xf32> to vector<8x32xf32>
      %316 = arith.addf %313, %315 : vector<8x32xf32>
      %cst_98 = arith.constant dense<0xFF800000> : vector<8xf32>
      %317 = vector.multi_reduction <maximumf>, %316, %cst_98 [1] : vector<8x32xf32> to vector<8xf32>
      %318 = vector.shape_cast %317 : vector<8xf32> to vector<8x1xf32>
      %319 = vector.broadcast %318 : vector<8x1xf32> to vector<8x32xf32>
      %320 = arith.subf %316, %319 : vector<8x32xf32>
      %321 = math.exp %320 : vector<8x32xf32>
      %cst_99 = arith.constant dense<0.000000e+00> : vector<8xf32>
      %322 = vector.multi_reduction <add>, %321, %cst_99 [1] : vector<8x32xf32> to vector<8xf32>
      %323 = vector.shape_cast %322 : vector<8xf32> to vector<8x1xf32>
      %324 = tpu.reciprocal %323 : vector<8x1xf32> -> vector<8x1xf32>
      %325 = vector.broadcast %324 : vector<8x1xf32> to vector<8x32xf32>
      %326 = arith.mulf %321, %325 : vector<8x32xf32>
      %c0_100 = arith.constant 0 : index
      %c0_101 = arith.constant 0 : index
      %c0_102 = arith.constant 0 : index
      %327 = vector.load %arg17[%c0_100, %c0_101, %c0_102] : memref<1x8x32xf32, #tpu.memory_space<vmem>>, vector<1x8x32xf32>
      %328 = vector.shape_cast %327 : vector<1x8x32xf32> to vector<8x32xf32>
      %329 = vector.shape_cast %326 : vector<8x32xf32> to vector<1x8x32xf32>
      tpu.vector_store %arg17[%c0_100, %c0_101, %c0_102], %329 {strides = array<i32>} : memref<1x8x32xf32, #tpu.memory_space<vmem>>, vector<1x8x32xf32>,
    } else {
    }
    return
  }
  func.func @transform_0(%arg0: i32, %arg1: i32) -> (i32, i32, i32) {
    %c0_i32 = arith.constant 0 : i32
    %c0_i32_0 = arith.constant 0 : i32
    %c0_i32_1 = arith.constant 0 : i32
    return %arg0, %c0_i32, %c0_i32_0 : i32, i32, i32
  }
  func.func @transform_1(%arg0: i32, %arg1: i32) -> (i32, i32, i32) {
    %c0_i32 = arith.constant 0 : i32
    %c0_i32_0 = arith.constant 0 : i32
    %c0_i32_1 = arith.constant 0 : i32
    return %arg0, %c0_i32, %c0_i32_0 : i32, i32, i32
  }
  func.func @transform_2(%arg0: i32, %arg1: i32) -> (i32, i32, i32) {
    %c0_i32 = arith.constant 0 : i32
    %c0_i32_0 = arith.constant 0 : i32
    %c0_i32_1 = arith.constant 0 : i32
    %c0_i32_2 = arith.constant 0 : i32
    return %c0_i32, %c0_i32_0, %c0_i32_1 : i32, i32, i32
  }
  func.func @transform_3(%arg0: i32, %arg1: i32) -> (i32, i32, i32) {
    %c0_i32 = arith.constant 0 : i32
    %c0_i32_0 = arith.constant 0 : i32
    %c0_i32_1 = arith.constant 0 : i32
    return %arg1, %c0_i32, %c0_i32_0 : i32, i32, i32
  }
  func.func @transform_4(%arg0: i32, %arg1: i32) -> (i32, i32, i32) {
    %c0_i32 = arith.constant 0 : i32
    %c0_i32_0 = arith.constant 0 : i32
    %c0_i32_1 = arith.constant 0 : i32
    return %arg1, %c0_i32, %c0_i32_0 : i32, i32, i32
  }
  func.func @transform_5(%arg0: i32, %arg1: i32) -> (i32, i32, i32) {
    %c0_i32 = arith.constant 0 : i32
    %c0_i32_0 = arith.constant 0 : i32
    %c0_i32_1 = arith.constant 0 : i32
    return %arg1, %c0_i32, %c0_i32_0 : i32, i32, i32
  }
  func.func @transform_6(%arg0: i32, %arg1: i32) -> (i32, i32, i32) {
    %c0_i32 = arith.constant 0 : i32
    %c0_i32_0 = arith.constant 0 : i32
    %c0_i32_1 = arith.constant 0 : i32
    return %arg1, %c0_i32, %c0_i32_0 : i32, i32, i32
  }
  func.func @transform_7(%arg0: i32, %arg1: i32) -> (i32, i32, i32) {
    %c0_i32 = arith.constant 0 : i32
    %c0_i32_0 = arith.constant 0 : i32
    %c0_i32_1 = arith.constant 0 : i32
    return %arg1, %c0_i32, %c0_i32_0 : i32, i32, i32
  }
  func.func @transform_8(%arg0: i32, %arg1: i32) -> (i32, i32, i32) {
    %c0_i32 = arith.constant 0 : i32
    %c0_i32_0 = arith.constant 0 : i32
    %c0_i32_1 = arith.constant 0 : i32
    return %arg1, %c0_i32, %c0_i32_0 : i32, i32, i32
  }
  func.func @transform_9(%arg0: i32, %arg1: i32) -> (i32, i32, i32) {
    %c0_i32 = arith.constant 0 : i32
    %c0_i32_0 = arith.constant 0 : i32
    %c0_i32_1 = arith.constant 0 : i32
    return %arg1, %c0_i32, %c0_i32_0 : i32, i32, i32
  }
  func.func @transform_10(%arg0: i32, %arg1: i32) -> (i32, i32, i32) {
    %c0_i32 = arith.constant 0 : i32
    %c0_i32_0 = arith.constant 0 : i32
    %c0_i32_1 = arith.constant 0 : i32
    return %arg1, %c0_i32, %c0_i32_0 : i32, i32, i32
  }
  func.func @transform_11(%arg0: i32, %arg1: i32) -> (i32, i32, i32) {
    %c0_i32 = arith.constant 0 : i32
    %c0_i32_0 = arith.constant 0 : i32
    %c0_i32_1 = arith.constant 0 : i32
    return %arg1, %c0_i32, %c0_i32_0 : i32, i32, i32
  }
  func.func @transform_12(%arg0: i32, %arg1: i32) -> (i32, i32, i32) {
    %c0_i32 = arith.constant 0 : i32
    %c0_i32_0 = arith.constant 0 : i32
    %c0_i32_1 = arith.constant 0 : i32
    return %arg1, %c0_i32, %c0_i32_0 : i32, i32, i32
  }
  func.func @transform_13(%arg0: i32, %arg1: i32) -> (i32, i32) {
    %c0_i32 = arith.constant 0 : i32
    %c0_i32_0 = arith.constant 0 : i32
    %c0_i32_1 = arith.constant 0 : i32
    return %c0_i32, %c0_i32_0 : i32, i32
  }
  func.func @transform_14(%arg0: i32, %arg1: i32) -> (i32, i32) {
    %c0_i32 = arith.constant 0 : i32
    %c0_i32_0 = arith.constant 0 : i32
    %c0_i32_1 = arith.constant 0 : i32
    return %c0_i32, %c0_i32_0 : i32, i32
  }
  func.func @transform_15(%arg0: i32, %arg1: i32) -> (i32, i32, i32) {
    %c0_i32 = arith.constant 0 : i32
    %c0_i32_0 = arith.constant 0 : i32
    %c0_i32_1 = arith.constant 0 : i32
    return %arg0, %c0_i32, %c0_i32_0 : i32, i32, i32
  }
}

</mosaic_0001>

<bundles_post_ra>
// kernel: transformer_decoder.1
= control target key start
LH: loop header
LB: loop body
LE: loop exit
PB: predicated region body
PF: predicated region fallthrough
CT: control target
= control target key end

     0   :  { %s4465_s0 = inlined_call_operand.hbm [shape: f32[2,8,32], index: 0, kind: input, shape index: {}]   ;;  %s4466_s1 = inlined_call_operand.vmem [shape: f32[2,12,32], index: 1, kind: input, shape index: {}]   ;;  %s4467_s2 = inlined_call_operand.vmem [shape: f32[1,8,32], index: 2, kind: input, shape index: {}]   ;;  %s4468_s3 = inlined_call_operand.vmem [shape: bf16[2,32,32], index: 3, kind: input, shape index: {}]   ;;  %s4469_s4 = inlined_call_operand.vmem [shape: bf16[2,32,64], index: 4, kind: input, shape index: {}]   ;;  %s4470_s5 = inlined_call_operand.vmem [shape: bf16[2,32,32], index: 5, kind: input, shape index: {}]   ;;  %s4471_s6 = inlined_call_operand.vmem [shape: bf16[2,32,32], index: 6, kind: input, shape index: {}]   ;;  %s4472_s7 = inlined_call_operand.hbm [shape: bf16[2,32,64], index: 7, kind: input, shape index: {}]   ;;  %s4473_s8 = inlined_call_operand.hbm [shape: bf16[2,32,32], index: 8, kind: input, shape index: {}]   ;;  %s4474_s9 = inlined_call_operand.hbm [shape: bf16[2,32,64], index: 9, kind: input, shape index: {}]   ;;  %s4475_s10 = inlined_call_operand.vmem [shape: bf16[2,64,32], index: 10, kind: input, shape index: {}]   ;;  %s4476_s11 = inlined_call_operand.hbm [shape: f32[2,16,32], index: 11, kind: input, shape index: {}]   ;;  %s4477_s12 = inlined_call_operand.hbm [shape: f32[2,8,64], index: 12, kind: input, shape index: {}]   ;;  %s4478_s13 = inlined_call_operand.vmem [shape: bf16[32,32], index: 13, kind: input, shape index: {}]   ;;  %s4479_s14 = inlined_call_operand.hbm [shape: f32[1,32], index: 14, kind: input, shape index: {}]   ;;  %s4480_s15 = inlined_call_operand.hbm [shape: f32[2,8,32], index: 15, kind: output, shape index: {}]  }
   0x1   :  { %4510 = sst [smem:[#allocation38_spill]] %s4465_s0 }
   0x2   :  { %4511 = sst [smem:[#allocation39_spill]] %s4466_s1 }
   0x3   :  { %4512 = sst [smem:[#allocation40_spill]] %s4467_s2 }
   0x4   :  { %4513 = sst [smem:[#allocation41_spill]] %s4468_s3 }
   0x5   :  { %4514 = sst [smem:[#allocation42_spill]] %s4469_s4 }
   0x6   :  { %4515 = sst [smem:[#allocation43_spill]] %s4470_s5 }
   0x7   :  { %4516 = sst [smem:[#allocation44_spill]] %s4471_s6 }
   0x8   :  { %4517 = sst [smem:[#allocation45_spill]] %s4472_s7 }
   0x9   :  { %4518 = sst [smem:[#allocation46_spill]] %s4473_s8 }
   0xa   :  { %4519 = sst [smem:[#allocation47_spill]] %s4474_s9 }
   0xb   :  { %4520 = sst [smem:[#allocation48_spill]] %s4475_s10 }
   0xc   :  { %4521 = sst [smem:[#allocation49_spill]] %s4476_s11 }
   0xd   :  { %4522 = sst [smem:[#allocation50_spill]] %s4477_s12 }
   0xe   :  { %4523 = sst [smem:[#allocation51_spill]] %s4478_s13 }
   0xf   :  { %4524 = sst [smem:[#allocation52_spill]] %s4479_s14 }
  0x10   :  { %4525 = sst [smem:[#allocation53_spill]] %s4480_s15 }
  0x11   :  { %20 = vsyncpa [#allocation4], 0 }
  0x12   :  { %22 = vsyncpa [#allocation4 + $0x1], 0 }
  0x13   :  { %23 = vsyncpa [#allocation7], 0 }
  0x14   :  { %25 = vsyncpa [#allocation7 + $0x1], 0 }
  0x15   :  { %26 = vsyncpa [#allocation10], 0 }
  0x16   :  { %28 = vsyncpa [#allocation10 + $0x1], 0 }
  0x17   :  { %29 = vsyncpa [#allocation13], 0 }
  0x18   :  { %31 = vsyncpa [#allocation13 + $0x1], 0 }
  0x19   :  { %32 = vsyncpa [#allocation5], 0 }
  0x1a   :  { %34 = vsyncpa [#allocation5 + $0x1], 0  ;;  %s3768_s18 = smov 0   ;;  %s3770_s19 = smov 0  }
  0x1b   :  { %s3772_s20 = smov 0   ;;  %s3774_s21 = smov 0  }
  0x1c   :  { %s3776_s22 = smov 0   ;;  %s3778_s23 = smov 0  }
  0x1d   :  { %s3780_s24 = smov 0   ;;  %s3782_s25 = smov 0  }
  0x1e   :  { %s3784_s26 = smov 0   ;;  %s3786_s27 = smov 0  }
  0x1f   :  { %s3788_s28 = smov 0  }
  0x20 LB: > { %4526 = sst [smem:[#allocation22_spill]] %s3623_s19  ;;  %s3822_s29 = sadd.s32 4294967295, %s3659_s28   ;;  %s3659_s28 = sphi %s3788_s28, %s40_s28   ;;  %s3655_s27 = sphi %s3786_s27, %s4614_s27   ;;  %s3651_s26 = sphi %s3784_s26, %s4613_s26   ;;  %s3647_s25 = sphi %s3782_s25, %s4612_s25   ;;  %s3643_s24 = sphi %s3780_s24, %s4611_s24   ;;  %s3639_s23 = sphi %s3778_s23, %s4610_s23   ;;  %s3635_s22 = sphi %s3776_s22, %s4609_s22   ;;  %s3631_s21 = sphi %s3774_s21, %s4608_s21   ;;  %s3627_s20 = sphi %s3772_s20, %s4616_s20   ;;  %s3623_s19 = sphi %s3770_s19, %s4615_s19   ;;  %s3619_s18 = sphi %s3768_s18, %s4607_s18  }
  0x21   : > { %4527 = sst [smem:[#allocation23_spill]] %s3631_s21  ;;  %s2774_s30 = sadd.s32 4294967294, %s3659_s28  }
  0x22   : > { %4528 = sst [smem:[#allocation24_spill]] %s3635_s22  ;;  %p4485_p0 = scmp.eq.s32.totalorder %s3659_s28, 0 }
  0x23   : > { %4529 = sst [smem:[#allocation25_spill]] %s3639_s23  ;;  %p72_p1 = scmp.ne.s32.totalorder %s3635_s22, %s3631_s21 }
  0x24   : > { %4530 = sst [smem:[#allocation26_spill]] %s3643_s24  ;;  %p4486_p2 = scmp.eq.s32.totalorder %s3822_s29, 0 }
  0x25   : > { %4531 = sst [smem:[#allocation27_spill]] %s3647_s25  ;;  %p243_p3 = scmp.ne.s32.totalorder %s3627_s20, %s3623_s19 }
  0x26   : > { %4532 = sst [smem:[#allocation28_spill]] %s3651_s26  ;;  %p249_p4 = scmp.ne.s32.totalorder %s3623_s19, %s3619_s18 }
  0x27   : > { %4533 = sst [smem:[#allocation29_spill]] %s3655_s27  ;;  %p3835_p5 = por %p4486_p2, %p72_p1 }
  0x28   : > { %p3842_p7 = por %p243_p3, %p4485_p0  ;;  %p3848_p8 = por %p249_p4, %p4486_p2 }
  0x29   : > { %s4534_s17 = scalar_select %p3835_p5, 1, 0 }
  0x2a   : > { %s4537_s16 = scalar_select %p3848_p8, 1, 0 }
  0x2b   : > { %4535 = sst [smem:[#allocation30_spill]] %s4534_s17  ;;  %p451_p9 = scmp.eq.s32.totalorder %s2774_s30, 3 }
  0x2c   : > { %4538 = sst [smem:[#allocation31_spill]] %s4537_s16  ;;  %p2775_p10 = scmp.ge.s32.totalorder %s3659_s28, 1 }
  0x2d   : > { %p458_p11 = scmp.lt.s32.totalorder %s3659_s28, 5  ;;  %p3854_p12 = por %p451_p9, %p72_p1 }
  0x2e   : > { %s3661_s13 = smov [#allocation14]   ;;  %s3872_s10 = sand.u32 1, %s3659_s28  }
  0x2f   : > { %s4539_s18 = scalar_select %p3854_p12, 1, 0 }
  0x30   : > { %p3858_p13 = pnand %p2775_p10, %p458_p11  ;;  %s477_s2 = sshll.u32 %s3661_s13, 4  ;;  %s478_s2 = int_to_ptr.vmem [resolvable:$true] %s477_s2 }
  0x31   : > { %4540 = sst [smem:[#allocation32_spill]] %s4539_s18  ;;  %s4487_s18 = sand.u32 1, %s3627_s20  }
  0x32   : > { %s4541_s21 = scalar_select %p3858_p13, 1, 0 }
  0x33   : > { %p3128_p3 = pneg %p3858_p13  ;;  %s3877_s6 = sshll.u32 %s4487_s18, 4 }
  0x34   : > { %4542 = sst [smem:[#allocation33_spill]] %s4541_s21  ;;  %s3340_s5 = scalar_lea.vmem %s478_s2, 16 }
  0x35   : > { %p3867_p6 = pnand %p3128_p3, %p4486_p2  ;;  %p3341_p9 = scmp.ne.s32.totalorder %s478_s2, %s3340_s5 }
  0x36   : > { %s3347_s13 = scalar_lea.vmem %s478_s2, 32  ;;  %p3348_p0 = scmp.lt.s32.totalorder %s478_s2, %s478_s2 }
  0x37   : > { %p3331_p1 = pneg %p3867_p6  ;;  %p3349_p4 = scmp.lt.s32.totalorder %s3347_s13, %s3340_s5 }
  0x39   : > { %p3343_p10 = pnand %p3341_p9, %p3331_p1  ;;  %p3350_p3 = por %p3349_p4, %p3348_p0 }
  0x3b   : > { %p3344_p11 = pneg %p3343_p10 }
  0x3d   : > { %p3351_p2 = pnand %p3350_p3, %p3344_p11 }
  0x3f   : > { %3354 = shalt.err (!%p3351_p2)
}
  0x40   : > { %s4544_s14 = sld [smem:[#allocation52_spill]]  ;;  %s3887_s18 = sshll.u32 %s3651_s26, 8 }
  0x41   : > { %s4545_s7 = sld [smem:[#allocation45_spill]]  ;;  %s550_s13 = scalar_lea.vmem [#allocation6], %s3877_s6 }
  0x42   : > { %s557_s25 = sshll.u32 %s550_s13, 4  ;;  %p4546_p0 = scmp.lt.s32.totalorder %s3659_s28, 4  ;;  %s558_s25 = int_to_ptr.vmem [resolvable:$true] %s557_s25 }
  0x43   : > { %s3368_s30 = scalar_lea.vmem %s558_s25, 256  ;;  %s3662_s1 = smov [#allocation6]  }
  0x44   : > { %p3898_p2 = pnand %p4546_p0, %p3842_p7  ;;  %p3369_p4 = scmp.ne.s32.totalorder %s558_s25, %s3368_s30 }
  0x45   : > { %s3373_s15 = sshll.u32 %s3662_s1, 4  ;;  %s3374_s15 = int_to_ptr.vmem [resolvable:$false] %s3373_s15 }
  0x46   : > { %3131 = dma.hbm_to_vmem [thread:$0]  (!%p3867_p6), %s4544_s14, 16, %s478_s2, [#allocation13]  }
  0x47   : > { %s556_s5 = scalar_lea.hbm %s4545_s7, %s3887_s18  ;;  %p3905_p6 = pneg %p3898_p2 }
  0x48   : > { %s3375_s24 = scalar_lea.vmem %s3374_s15, 512  ;;  %p3376_p7 = scmp.lt.s32.totalorder %s558_s25, %s3374_s15 }
  0x49   : > { %p3371_p1 = pnand %p3369_p4, %p3905_p6  ;;  %p3377_p10 = scmp.lt.s32.totalorder %s3375_s24, %s3368_s30 }
  0x4b   : > { %p3372_p9 = pneg %p3371_p1  ;;  %p3378_p11 = por %p3377_p10, %p3376_p7 }
  0x4d   : > { %p3379_p3 = pnand %p3378_p11, %p3372_p9 }
  0x4f   : > { %3382 = shalt.err (!%p3379_p3)
}
  0x50   : > { %s4497_s13 = smov 64   ;;  %s4498_s4 = smov 4  }
  0x51   : > { %s4549_s1 = scalar_lea.sflag [#allocation7], %s3872_s10  ;;  %s4550_s9 = sld [smem:[#allocation47_spill]] }
  0x52   : > { %3138 = dma.hbm_to_vmem [thread:$0]  (!%p3898_p2), %s556_s5, 256, %s558_s25, %s4549_s1, %s4497_s13, %s4497_s13, %s4498_s4  }
  0x53   : > { %s592_s24 = scalar_lea.vmem [#allocation9], %s3877_s6  ;;  %s4496_s16 = scalar_lea.sflag [#allocation10], %s3872_s10 }
  0x54   : > { %s599_s14 = sshll.u32 %s592_s24, 4  ;;  %s3665_s17 = smov [#allocation9]   ;;  %s600_s14 = int_to_ptr.vmem [resolvable:$true] %s599_s14 }
  0x55   : > { %s3396_s19 = scalar_lea.vmem %s600_s14, 256  ;;  %s3401_s21 = sshll.u32 %s3665_s17, 4  ;;  %s3402_s21 = int_to_ptr.vmem [resolvable:$false] %s3401_s21 }
  0x56   : > { %p3397_p0 = scmp.ne.s32.totalorder %s600_s14, %s3396_s19  ;;  %s3403_s12 = scalar_lea.vmem %s3402_s21, 512 }
  0x57   : > { %s598_s30 = scalar_lea.hbm %s4550_s9, %s3887_s18  ;;  %p3404_p9 = scmp.lt.s32.totalorder %s600_s14, %s3402_s21 }
  0x58   : > { %p3399_p4 = pnand %p3397_p0, %p3905_p6  ;;  %p3405_p7 = scmp.lt.s32.totalorder %s3403_s12, %s3396_s19 }
  0x5a   : > { %p3400_p1 = pneg %p3399_p4  ;;  %p3406_p10 = por %p3405_p7, %p3404_p9 }
  0x5c   : > { %p3407_p11 = pnand %p3406_p10, %p3400_p1 }
  0x5e   : > { %3410 = shalt.err (!%p3407_p11)
}
  0x5f   : > { %3144 = dma.hbm_to_vmem [thread:$0]  (!%p3898_p2), %s598_s30, 256, %s600_s14, %s4496_s16, %s4497_s13, %s4497_s13, %s4498_s4  }
  0x60   : > { %s49_s7 = sadd.s32 1, %s3651_s26  ;;  %s52_s12 = sadd.s32 1, %s3655_s27 }
  0x61   : > { %p50_p3 = scmp.ge.s32.totalorder %s49_s7, 2  ;;  %s59_s19 = sadd.s32 1, %s3639_s23 }
  0x62   : > { %p66_p0 = scmp.ne.s32.totalorder %s3639_s23, %s3635_s22  ;;  %s488_s21 = sand.u32 1, %s3639_s23  }
  0x63   : > { %s4618_s7 = smov (%p50_p3, %s49_s7), 0  ;;  %s4620_s12 = smov (!%p50_p3, %s52_s12), %s3655_s27 }
  0x64   : > { %4551 = sst [smem:[#allocation34_spill]] %s4618_s7  ;;  %p4552_p4 = scmp.eq.s32.totalorder %s3659_s28, 0 }
  0x65   : > { %s233_s14 = ssub.s32 %s3651_s26, %s4618_s7  ;;  %p54_p9 = scmp.ge.s32.totalorder %s4620_s12, 2 }
  0x66   : > { %p3944_p1 = por %p4552_p4, %p66_p0  ;;  %p234_p7 = scmp.eq.s32.totalorder %s233_s14, 0 }
  0x67   : > { %p4554_p10 = scmp.eq.s32.totalorder %s3822_s29, 3  ;;  %s4622_s12 = smov (%p54_p9, %s4620_s12), 0 }
  0x68   : > { %4557 = sst [smem:[#allocation36_spill]] %s4622_s12  ;;  %s4558_s5 = sadd.s32 1, %s3627_s20 }
  0x69   : > { %p3952_p11 = por %p4554_p10, %p66_p0  ;;  %s56_s15 = ssub.s32 %s3655_s27, %s4622_s12 }
  0x6a   : > { %s3961_s1 = scalar_select %p234_p7, %s3627_s20, %s4558_s5  }
  0x6b   : > { %s4555_s17 = scalar_select %p3952_p11, 1, 0 }
  0x6c   : > { %s2778_s30 = sshll.u32 %s488_s21, 3  ;;  %p57_p3 = scmp.eq.s32.totalorder %s56_s15, 0 }
  0x6d   : > { %4556 = sst [smem:[#allocation35_spill]] %s4555_s17  ;;  %s2779_s24 = sshll.u32 %s3655_s27, 7 }
  0x6e   : > { %s492_s16 = scalar_lea.vmem [#allocation3], %s2778_s30  ;;  %s4560_s0 = sld [smem:[#allocation38_spill]] }
  0x6f   : > { %s499_s13 = sshll.u32 %s492_s16, 4  ;;  %p4561_p0 = scmp.lt.s32.totalorder %s3659_s28, 4  ;;  %s500_s13 = int_to_ptr.vmem [resolvable:$true] %s499_s13 }
  0x70   : > { %s3967_s4 = scalar_select %p57_p3, %s3639_s23, %s59_s19  }
  0x71   : > { %p3976_p4 = pnand %p4561_p0, %p3944_p1  ;;  %s4563_s8 = sld [smem:[#allocation46_spill]] }
  0x72   : > { %4559 = sst [smem:[#allocation37_spill]] %s3967_s4  ;;  %s571_s30 = scalar_lea.vmem [#allocation8], %s3877_s6 }
  0x73   : > { %s578_s16 = sshll.u32 %s571_s30, 4  ;;  %s489_s19 = scalar_lea.sflag [#allocation4], %s488_s21  ;;  %s3985_s16 = int_to_ptr.vmem [resolvable:$true] %s578_s16 }
  0x74   : > { %s497_s7 = scalar_lea.hbm %s4560_s0, %s2779_s24  ;;  %p3413_p9 = pneg %p3976_p4 }
  0x75   : > { %s3424_s9 = scalar_lea.vmem %s500_s13, 128  ;;  %s3666_s25 = smov [#allocation3]  }
  0x76   : > { %p3425_p7 = scmp.ne.s32.totalorder %s500_s13, %s3424_s9  ;;  %s3429_s24 = sshll.u32 %s3666_s25, 4  ;;  %s3430_s24 = int_to_ptr.vmem [resolvable:$false] %s3429_s24 }
  0x77   : > { %s577_s15 = scalar_lea.hbm %s4563_s8, %s3887_s18  ;;  %s3431_s14 = scalar_lea.vmem %s3430_s24, 256 }
  0x78   : > { %p3427_p10 = pnand %p3425_p7, %p3413_p9  ;;  %p3432_p1 = scmp.lt.s32.totalorder %s500_s13, %s3430_s24 }
  0x79   : > { %p3433_p0 = scmp.lt.s32.totalorder %s3431_s14, %s3424_s9 }
  0x7a   : > { %p3428_p3 = pneg %p3427_p10 }
  0x7b   : > { %p3434_p12 = por %p3433_p0, %p3432_p1 }
  0x7d   : > { %p3435_p11 = pnand %p3434_p12, %p3428_p3 }
  0x7f   : > { %3438 = shalt.err (!%p3435_p11)
}
  0x80   : > { %3135 = dma.hbm_to_vmem [thread:$0]  (!%p3976_p4), %s497_s7, 128, %s500_s13, %s489_s19  }
  0x81   : > { %s3452_s12 = scalar_lea.vmem %s3985_s16, 256  ;;  %s3667_s21 = smov [#allocation8]  }
  0x82   : > { %p3453_p8 = scmp.ne.s32.totalorder %s3985_s16, %s3452_s12  ;;  %s3457_s5 = sshll.u32 %s3667_s21, 4  ;;  %s3458_s5 = int_to_ptr.vmem [resolvable:$false] %s3457_s5 }
  0x83   : > { %s3459_s30 = scalar_lea.vmem %s3458_s5, 512  ;;  %p3460_p10 = scmp.lt.s32.totalorder %s3985_s16, %s3458_s5 }
  0x84   : > { %p3455_p9 = pnand %p3453_p8, %p3905_p6  ;;  %p3461_p1 = scmp.lt.s32.totalorder %s3459_s30, %s3452_s12 }
  0x86   : > { %p3456_p7 = pneg %p3455_p9  ;;  %p3462_p12 = por %p3461_p1, %p3460_p10 }
  0x88   : > { %p3463_p11 = pnand %p3462_p12, %p3456_p7 }
  0x8a   : > { %3466 = shalt.err (!%p3463_p11)
}
  0x8b   : > { %s4564_s17 = smov 4   ;;  %s4565_s9 = smov 64  }
  0x8c   : > { %s4566_s13 = scalar_lea.sflag [#allocation7], %s3872_s10  ;;  %s4567_s11 = sld [smem:[#allocation49_spill]] }
  0x8d   : > { %3141 = dma.hbm_to_vmem [thread:$0]  (!%p3898_p2), %s577_s15, 256, %s3985_s16, %s4566_s13, %s4565_s9, %s4565_s9, %s4564_s17  }
  0x8e   : > { %s621_s12 = scalar_lea.vmem [#allocation11], %s3877_s6  ;;  %s3668_s30 = smov [#allocation11]  }
  0x8f   : > { %s628_s21 = sshll.u32 %s621_s12, 4  ;;  %s3485_s7 = sshll.u32 %s3668_s30, 4  ;;  %s629_s21 = int_to_ptr.vmem [resolvable:$true] %s628_s21  ;;  %s3486_s7 = int_to_ptr.vmem [resolvable:$false] %s3485_s7 }
  0x90   : > { %s3480_s5 = scalar_lea.vmem %s629_s21, 256  ;;  %s3487_s19 = scalar_lea.vmem %s3486_s7, 512 }
  0x91   : > { %p3481_p8 = scmp.ne.s32.totalorder %s629_s21, %s3480_s5  ;;  %p3488_p0 = scmp.lt.s32.totalorder %s629_s21, %s3486_s7 }
  0x92   : > { %s627_s14 = scalar_lea.hbm %s4567_s11, %s3887_s18  ;;  %p3489_p9 = scmp.lt.s32.totalorder %s3487_s19, %s3480_s5 }
  0x93   : > { %p3483_p4 = pnand %p3481_p8, %p3905_p6 }
  0x94   : > { %p3490_p7 = por %p3489_p9, %p3488_p0 }
  0x95   : > { %p3484_p3 = pneg %p3483_p4 }
  0x97   : > { %p3491_p10 = pnand %p3490_p7, %p3484_p3 }
  0x99   : > { %3494 = shalt.err (!%p3491_p10)
}
  0x9a   : > { %s3669_s15 = smov 128   ;;  %s3670_s6 = smov 8  }
  0x9b   : > { %s4568_s18 = scalar_lea.sflag [#allocation10], %s3872_s10  ;;  %s4569_s16 = sand.u32 1, %s3627_s20  }
  0x9c   : > { %3147 = dma.hbm_to_vmem [thread:$0]  (!%p3898_p2), %s627_s14, 256, %s629_s21, %s4568_s18, %s3669_s15, %s3669_s15, %s3670_s6  }
  0x9d   : > { %s2792_s17 = sshll.u32 %s4569_s16, 3  ;;  %s2793_s9 = sshll.u32 %s3651_s26, 7 }
  0x9e   : > { %s4570_s24 = sld [smem:[#allocation50_spill]]  ;;  %s642_s5 = scalar_lea.vmem [#allocation12], %s2792_s17 }
  0x9f   : > { %s649_s30 = sshll.u32 %s642_s5, 4  ;;  %s639_s7 = scalar_lea.sflag [#allocation13], %s3872_s10  ;;  %s650_s30 = int_to_ptr.vmem [resolvable:$true] %s649_s30 }
  0xa0   : > { %s3508_s19 = scalar_lea.vmem %s650_s30, 128  ;;  %s3671_s0 = smov [#allocation12]  }
  0xa1   : > { %p3509_p1 = scmp.ne.s32.totalorder %s650_s30, %s3508_s19  ;;  %s3513_s8 = sshll.u32 %s3671_s0, 4  ;;  %s3514_s8 = int_to_ptr.vmem [resolvable:$false] %s3513_s8 }
  0xa2   : > { %s3515_s14 = scalar_lea.vmem %s3514_s8, 256  ;;  %p3516_p8 = scmp.lt.s32.totalorder %s650_s30, %s3514_s8 }
  0xa3   : > { %p3511_p12 = pnand %p3509_p1, %p3905_p6  ;;  %p3517_p4 = scmp.lt.s32.totalorder %s3515_s14, %s3508_s19 }
  0xa4   : > { %s647_s12 = scalar_lea.hbm %s4570_s24, %s2793_s9 }
  0xa5   : > { %p3512_p11 = pneg %p3511_p12  ;;  %p3518_p3 = por %p3517_p4, %p3516_p8 }
  0xa7   : > { %p3519_p0 = pnand %p3518_p3, %p3512_p11 }
  0xa9   : > { %3522 = shalt.err (!%p3519_p0)
}
  0xaa   : > { %3150 = dma.hbm_to_vmem [thread:$0]  (!%p3898_p2), %s647_s12, 128, %s650_s30, %s639_s7  }
  0xab   : > { %658 = sbr.rel (%p3858_p13) target bundleno = 4802 (0x12c2), region = 80  ;;  %s4034_s2 = sand.u32 (!%p3858_p13), 1, %s3635_s22  }
  0xac   : > { %s4505_s0 = sshll.u32 (!%p3858_p13), %s4034_s2, 3  ;;  %s661_s15 = scalar_lea.sflag (!%p3858_p13), [#allocation4], %s4034_s2 }
  0xad   : > { %s4040_s8 = scalar_lea.vmem (!%p3858_p13), [#allocation3], %s4505_s0 }
  0xb0   : > { %3594 = dma.done.wait (%p3835_p5), %s661_s15, 128  }
  0xb1   : > { %3596 = vsyncadd (%p3835_p5), %s661_s15, 4294967168  ;;  %s4573_s3 = sld [smem:[#allocation22_spill]]  ;;  %s669_s18 = sand.u32 1, %s3822_s29  }
  0xb2   : > { %s4574_s6 = sld [smem:[#allocation31_spill]]  ;;  %s670_s9 = scalar_lea.sflag [#allocation7], %s669_s18 }
  0xb7   : > { %s671_s16 = sand.u32 1, %s4573_s3  }
  0xb8   : > { %s4048_s17 = sshll.u32 %s671_s16, 4  ;;  %p4575_p13 = scmp.ne.s32.totalorder %s4574_s6, 0 }
  0xba   : > { %3598 = dma.done.wait (%p4575_p13), %s670_s9, 512  }
  0xbb   : > { %3600 = vsyncadd (%p4575_p13), %s670_s9, 4294966784  ;;  %s688_s24 = scalar_lea.sflag [#allocation10], %s669_s18 }
  0xbc   : > { %3602 = dma.done.wait (%p4575_p13), %s688_s24, 512  }
  0xbd   : > { %3604 = vsyncadd (%p4575_p13), %s688_s24, 4294966784  ;;  %s4061_s5 = sshll.u32 %s671_s16, 3  ;;  %s706_s7 = scalar_lea.sflag [#allocation13], %s669_s18 }
  0xbe   : > { %3606 = dma.done.wait (%p4575_p13), %s706_s7, 128  }
  0xbf   : > { %3608 = vsyncadd (%p4575_p13), %s706_s7, 4294967168  ;;  %p4576_p5 = scmp.eq.s32.totalorder %s3822_s29, 0 }
  0xc1   : > { %3610 = dma.done.wait (%p4576_p5), [#allocation13], 16   ;;  %p4577_p2 = pmov %p4576_p5 }
  0xc2   : > { %s4578_s14 = sld [smem:[#allocation27_spill]]  ;;  %s4586_s7 = sshll.u32 %s4034_s2, 3 }
  0xc3   : > { %3612 = vsyncadd (%p4577_p2), [#allocation13], 4294967280  ;;  %s4579_s21 = sld [smem:[#allocation26_spill]] }
  0xc4   : > { %s4580_s6 = sld [smem:[#allocation39_spill]] }
  0xc5   : > { %s4581_s29 = sld [smem:[#allocation41_spill]] }
  0xc6   : > { %s4582_s13 = sld [smem:[#allocation42_spill]] }
  0xc7   : > { %s4583_s27 = sld [smem:[#allocation43_spill]] }
  0xc8   : > { %p815_p6 = scmp.lt.s32.totalorder %s4578_s14, 1  ;;  %s4584_s23 = sld [smem:[#allocation44_spill]] }
  0xc9   : > { %p820_p9 = scmp.lt.s32.totalorder %s4579_s21, 1  ;;  %s4585_s22 = sld [smem:[#allocation48_spill]] }
  0xca   : > { %s4624_s14 = smov (!%p815_p6, %s4578_s14), 1  ;;  %p2815_p7 = scmp.ne.s32.totalorder %s4579_s21, 0 }
  0xcb   : > { %s821_s10 = scalar_select %p820_p9, %s4579_s21, 1 }
  0xcc   : > { %s2871_s15 = sshll.u32 %s4624_s14, 4  ;;  %s4587_s0 = sld [smem:[#allocation40_spill]] (!%p2815_p7) }
  0xcd   : > { %s4080_s16 = scalar_lea.vmem %s4580_s6, %s2871_s15  ;;  %s2872_s9 = sshll.u32 %s821_s10, 4 }
  0xce   : > { %s824_s19 = scalar_lea.vmem %s4581_s29, %s2872_s9  ;;  %s829_s30 = scalar_lea.vmem %s4582_s13, %s2872_s9 }
  0xcf   : > { %s4091_s26 = scalar_lea.vmem %s4583_s27, %s2872_s9  ;;  %s4096_s3 = scalar_lea.vmem %s4584_s23, %s2872_s9 }
  0xd0   : > { %s2876_s15 = sshll.u32 %s821_s10, 5  ;;  %s4105_s29 = scalar_lea.vmem [#allocation15], %s4586_s7 }
  0xd1   : > { %s4101_s24 = scalar_lea.vmem %s4585_s22, %s2876_s15  ;;  %849 = sbr.rel (%p2815_p7) target bundleno = 218 (0xda), region = 112 }
  0xd6   : > { %v850_v0 = vld [vmem:[%s4040_s8] sm:$0xff]  ;;  %v851_v1 = vld [vmem:[%s4587_s0] sm:$0xff]  ;;  %vm853_vm0 = vcmask 261120  }
  0xd7   : > { %v852_v2 = vadd.f32 %v851_v1, %v850_v0 }
  0xd9   : > { %854 = vst.msk [vmem:[#allocation2] sm:$0xff] %vm853_vm0, %v852_v2 }
  0xda PF: > { %v3267_v3 = vld [vmem:[%s829_s30 + $0x8] sm:$0xff]   ;;  %v3672_v4 = vmov 0.0   ;;  %v3269_v6 = vld [vmem:[%s829_s30] sm:$0xff]   ;;  %vm3673_vm1 = vmmov 0   ;;  %vm890_vm2 = vcmask 261120   ;;  %v874_v10 = vlaneseq  ;;  %s4588_s22 = scalar_lea.vmem [#allocation11], %s4048_s17 }
  0xdb   : > { %2946 = vmatprep.subr.bf16.mxu1 %v3672_v4  ;;  %2938 = vmatprep.subr.bf16.mxu0 %v3672_v4  ;;  %v3268_v5 = vld [vmem:[%s824_s19 + $0x8] sm:$0xff]   ;;  %v3270_v7 = vld [vmem:[%s824_s19] sm:$0xff]   ;;  %vm1002_vm3 = vcmask 64512   ;;  %s3674_s23 = smov 112   ;;  %s3675_s4 = smov 120   ;;  %vm1068_vm4 = vcmask 1043456  }
  0xdc   : > { %2947 = vmatpush3.bf16.msra.mxu1 %v3267_v3  ;;  %2950 = vmatprep.mubr.msk.bf16.mxu1 %vm3673_vm1, %v3672_v4  ;;  %v4132_v11 = vshrl.u32 %v874_v10, 7  ;;  %v4137_v13 = vld [vmem:[%s4588_s22] sm:$0xff]  ;;  %s3676_s8 = smov 104   ;;  %s3677_s13 = smov 32   ;;  %vm1457_vm5 = vcmask 130048   ;;  %vm1459_vm6 = vcmask 195584  }
  0xdd   : > { %2939 = vmatpush3.bf16.msra.mxu0 %v3268_v5  ;;  %2948 = vmatprep.subr.bf16.mxu1 %v3672_v4  ;;  %s3678_s25 = smov 96   ;;  %s3679_s12 = smov 80   ;;  %vm1739_vm7 = vcmask 97280   ;;  %vm1759_vm8 = vcmask 1045504   ;;  %vm2336_vm9 = vcmask 523264  }
  0xde   : > { %2940 = vmatprep.subr.bf16.mxu0 %v3672_v4  ;;  %2942 = vmatprep.mubr.msk.bf16.mxu0 %vm3673_vm1, %v3672_v4  ;;  %v988_v12 = vsub.s32 1, %v4132_v11  ;;  %v4140_v14 = vsub.s32 0, %v4132_v11  ;;  %v993_v52 = vsub.s32 2, %v4132_v11  ;;  %s3680_s30 = smov 72   ;;  %s3681_s19 = smov 88  }
  0xdf   : > { %s3682_s21 = smov 8   ;;  %s3683_s10 = smov 16  }
  0xe0   : > { %v4118_v8 = vld [vmem:[#allocation2] sm:$0xff]  ;;  %2949 = vmatpush3.bf16.msra.mxu1 %v3269_v6  ;;  %v989_v15 = vrot.slane %v4137_v13, %v988_v12  ;;  %v877_v16 = vrot.slane %v4137_v13, %v4140_v14  ;;  %v994_v55 = vrot.slane %v4137_v13, %v993_v52  ;;  %s3684_s9 = smov 24   ;;  %s4594_s18 = scalar_lea.vmem [#allocation9], %s4048_s17 }
  0xe1   : > { %v873_v9 = vpack.c.bf16 %v4118_v8, %v4118_v8  ;;  %2941 = vmatpush3.bf16.msra.mxu0 %v3270_v7  ;;  %2960 = vmatprep.subr.bf16.mxu1 %v3672_v4  ;;  %s4595_s6 = smov %s4594_s18 }
  0xe2   : > { %2954 = vmatprep.subr.bf16.mxu0 %v3672_v4 }
  0xe3   : > { %2951 = vmatmul.mubr.msk.bf16.vlgmr.msra.gmra.mxu1 %vm890_vm2, %v873_v9 }
  0xe4   : > { %2943 = vmatmul.mubr.msk.bf16.vlgmr.msra.gmra.mxu0 %vm890_vm2, %v873_v9  ;;  %2962 = vmatprep.mubr.msk.bf16.mxu1 %vm3673_vm1, %v3672_v4 }
  0xe5   : > { %2956 = vmatprep.mubr.msk.bf16.mxu0 %vm3673_vm1, %v3672_v4 }
 0x1a3   : > { %v4147_v17 = vpop.f32.mrf.mxu1 }
 0x1a4   : > { %v990_v18 = vadd.f32 %v989_v15, %v4147_v17  ;;  %v928_v19 = vpop.f32.mrf.mxu0 }
 0x1a5   : > { %v929_v20 = vadd.f32 %v928_v19, %v877_v16  ;;  %v2952_v21 = vpop.f32.mrf.mxu1 }
 0x1a6   : > { %v1001_v22 = vpack.c.bf16 %v990_v18, %v990_v18  ;;  %v2944_v23 = vpop.f32.mrf.mxu0 }
 0x1a7   : > { %v983_v24 = vpop.f32.mrf.mxu1  ;;  %v1000_v25 = vpack.c.bf16 %v929_v20, %v929_v20 }
 0x1a8   : > { %1226 = vrot.lane.b32.xlu1 %v1001_v22, %s3674_s23  ;;  %1116 = vrot.lane.b32.xlu0 %v1001_v22, %s3675_s4  ;;  %v931_v26 = vpop.f32.mrf.mxu0  ;;  %v1007_v27 = vsel %vm1002_vm3, %v1001_v22, 0 }
 0x1a9   : > { %v2953_v28 = vpop.f32.mrf.mxu1  ;;  %2955 = vmatpush3.bf16.xpose.msra.mxu0 %v1007_v27 }
 0x1aa   : > { %v2945_v29 = vpop.f32.mrf.mxu0  ;;  %2966 = vmatprep.subr.bf16.mxu0 %v3672_v4 }
 0x1ac   : > { %1224 = vrot.lane.b32.xlu1 %v1000_v25, %s3674_s23  ;;  %1113 = vrot.lane.b32.xlu0 %v1000_v25, %s3675_s4 }
 0x1b0   : > { %1334 = vrot.lane.b32.xlu1 %v1000_v25, %s3676_s8  ;;  %1336 = vrot.lane.b32.xlu0 %v1001_v22, %s3676_s8 }
 0x1b1   : > { %2957 = vmatmul.mubr.msk.bf16.vlgmr.msra.gmra.mxu0 %vm1002_vm3, %v1000_v25 }
 0x1b2   : > { %2968 = vmatprep.mubr.msk.bf16.mxu0 %vm3673_vm1, %v3672_v4 }
 0x21a   : > { %v1117_v30 = vpop.permute.xlu0 %1116  ;;  %v1227_v32 = vpop.permute.xlu1 %1226 }
 0x21b   : > { %v1122_v31 = vsel %vm1002_vm3, %v1117_v30, 0  ;;  %v1232_v34 = vsel %vm1002_vm3, %v1227_v32, 0 }
 0x21c   : > { %2967 = vmatpush3.bf16.xpose.msra.mxu0 %v1122_v31 }
 0x21d   : > { %2978 = vmatprep.subr.bf16.mxu0 %v3672_v4 }
 0x21e   : > { %v1114_v33 = vpop.permute.xlu0 %1113  ;;  %v1225_v36 = vpop.permute.xlu1 %1224 }
 0x222   : > { %v1337_v35 = vpop.permute.xlu0 %1336  ;;  %v1335_v38 = vpop.permute.xlu1 %1334 }
 0x223   : > { %2969 = vmatmul.mubr.msk.bf16.vlgmr.msra.gmra.mxu0 %vm1002_vm3, %v1114_v33  ;;  %v1342_v37 = vsel %vm1002_vm3, %v1337_v35, 0 }
 0x224   : > { %2979 = vmatpush3.bf16.xpose.msra.mxu0 %v1232_v34  ;;  %2980 = vmatprep.mubr.msk.bf16.mxu0 %vm3673_vm1, %v3672_v4 }
 0x225   : > { %2990 = vmatprep.subr.bf16.mxu0 %v3672_v4 }
 0x22b   : > { %2981 = vmatmul.mubr.msk.bf16.vlgmr.msra.gmra.mxu0 %vm1002_vm3, %v1225_v36 }
 0x22c   : > { %2991 = vmatpush3.bf16.xpose.msra.mxu0 %v1342_v37  ;;  %2992 = vmatprep.mubr.msk.bf16.mxu0 %vm3673_vm1, %v3672_v4 }
 0x22d   : > { %3002 = vmatprep.subr.bf16.mxu0 %v3672_v4 }
 0x233   : > { %2993 = vmatmul.mubr.msk.bf16.vlgmr.msra.gmra.mxu0 %vm1002_vm3, %v1335_v38 }
 0x234   : > { %3006 = vmatprep.mubr.msk.bf16.mxu0 %vm3673_vm1, %v3672_v4 }
 0x271   : > { %v1043_v39 = vpop.f32.mrf.mxu0 }
 0x272   : > { %v1049_v40 = vsel %vm1002_vm3, %v1043_v39, -inf }
 0x273   : > { %1050 = vmax.xlane.f32.xlu0 %v1049_v40  ;;  %v2958_v41 = vpop.f32.mrf.mxu0 }
 0x275   : > { %v1046_v42 = vpop.f32.mrf.mxu0 }
 0x277   : > { %v2959_v43 = vpop.f32.mrf.mxu0 }
 0x2e3   : > { %v1158_v44 = vpop.f32.mrf.mxu0 }
 0x2e4   : > { %v1164_v45 = vsel %vm1002_vm3, %v1158_v44, -inf }
 0x2e5   : > { %1165 = vmax.xlane.f32.xlu1 %v1164_v45  ;;  %v2970_v46 = vpop.f32.mrf.mxu0 }
 0x2e7   : > { %v1161_v47 = vpop.f32.mrf.mxu0 }
 0x2e9   : > { %v2971_v48 = vpop.f32.mrf.mxu0 }
 0x2eb   : > { %v1268_v49 = vpop.f32.mrf.mxu0 }
 0x2ec   : > { %v1274_v50 = vsel %vm1002_vm3, %v1268_v49, -inf }
 0x2ed   : > { %1275 = vmax.xlane.f32.xlu0 %v1274_v50  ;;  %v2982_v51 = vpop.f32.mrf.mxu0 }
 0x2ef   : > { %v1271_v53 = vpop.f32.mrf.mxu0 }
 0x2f1   : > { %v2983_v54 = vpop.f32.mrf.mxu0 }
 0x2f3   : > { %v1378_v56 = vpop.f32.mrf.mxu0 }
 0x2f4   : > { %v1384_v57 = vsel %vm1002_vm3, %v1378_v56, -inf }
 0x2f5   : > { %1385 = vmax.xlane.f32.xlu0 %v1384_v57  ;;  %v2994_v58 = vpop.f32.mrf.mxu0 }
 0x2f6   : > { %996 = vrot.lane.b32.xlu1 %v994_v55, %s3677_s13  ;;  %v3271_v55 = vld [vmem:[%s4091_s26 + $0x8] sm:$0xff]   ;;  %v3272_v58 = vld [vmem:[%s4091_s26] sm:$0xff]   ;;  %s4589_s26 = scalar_lea.vmem [#allocation6], %s4048_s17 }
 0x2f7   : > { %v1381_v59 = vpop.f32.mrf.mxu0  ;;  %3003 = vmatpush3.bf16.msra.mxu0 %v3271_v55  ;;  %s4590_s14 = smov %s4589_s26 }
 0x2f8   : > { %3004 = vmatprep.subr.bf16.mxu0 %v3672_v4 }
 0x2f9   : > { %v2995_v60 = vpop.f32.mrf.mxu0 }
 0x2fb   : > { %3005 = vmatpush3.bf16.msra.mxu0 %v3272_v58 }
 0x2fc   : > { %v1051_v61 = vpop.xlane.xlu0 %1050  ;;  %3018 = vmatprep.subr.bf16.mxu0 %v3672_v4 }
 0x2fd   : > { %v1052_v62 = vsub.f32 %v1043_v39, %v1051_v61 }
 0x2ff   : > { %v1053_v63 = vmul.f32 1.442695, %v1052_v62 }
 0x301   : > { %3285 = vpow2.f32 %v1053_v63 }
 0x30e   : > { %v3286_v0 = vpop.eup %3285 }
 0x30f   : > { %v1055_v1 = vsel %vm1002_vm3, %v3286_v0, 0.0 }
 0x310   : > { %1056 = vadd.xlane.f32.xlu0 %v1055_v1 }
 0x36e   : > { %v1166_v2 = vpop.xlane.xlu1 %1165 }
 0x36f   : > { %v1167_v3 = vsub.f32 %v1158_v44, %v1166_v2 }
 0x371   : > { %v1168_v5 = vmul.f32 1.442695, %v1167_v3 }
 0x372   : > { %v997_v6 = vpop.permute.xlu1 %996 }
 0x373   : > { %3287 = vpow2.f32 %v1168_v5  ;;  %v999_v7 = vadd.f32 %v997_v6, %v4147_v17 }
 0x375   : > { %v1061_v9 = vpack.c.bf16 %v999_v7, %v999_v7 }
 0x376   : > { %v1276_v10 = vpop.xlane.xlu0 %1275 }
 0x377   : > { %v1277_v15 = vsub.f32 %v1268_v49, %v1276_v10  ;;  %1063 = vrot.lane.b32.xlu1 %v1061_v9, %s3678_s25 }
 0x379   : > { %v1278_v16 = vmul.f32 1.442695, %v1277_v15 }
 0x37b   : > { %3289 = vpow2.f32 %v1278_v16  ;;  %1286 = vrot.lane.b32.xlu1 %v1061_v9, %s3679_s12 }
 0x37e   : > { %v1386_v18 = vpop.xlane.xlu0 %1385 }
 0x37f   : > { %v1387_v19 = vsub.f32 %v1378_v56, %v1386_v18  ;;  %1396 = vrot.lane.b32.xlu1 %v1061_v9, %s3680_s30 }
 0x380   : > { %v3288_v20 = vpop.eup %3287 }
 0x381   : > { %v1388_v21 = vmul.f32 1.442695, %v1387_v19  ;;  %v1170_v17 = vsel %vm1002_vm3, %v3288_v20, 0.0  ;;  %v1464_v19 = vsub.s32 3, %v4132_v11 }
 0x382   : > { %1171 = vadd.xlane.f32.xlu0 %v1170_v17 }
 0x383   : > { %3291 = vpow2.f32 %v1388_v21 }
 0x388   : > { %v3290_v22 = vpop.eup %3289 }
 0x389   : > { %v1280_v23 = vsel %vm1002_vm3, %v3290_v22, 0.0 }
 0x38a   : > { %1281 = vadd.xlane.f32.xlu0 %v1280_v23 }
 0x390   : > { %v3292_v24 = vpop.eup %3291 }
 0x391   : > { %v1390_v25 = vsel %vm1002_vm3, %v3292_v24, 0.0 }
 0x392   : > { %1391 = vadd.xlane.f32.xlu0 %v1390_v25 }
 0x399   : > { %v1057_v26 = vpop.xlane.xlu0 %1056 }
 0x39a   : > { %3293 = vrcp.f32 %v1057_v26 }
 0x3a7   : > { %v3294_v27 = vpop.eup %3293 }
 0x3a8   : > { %1176 = vrot.lane.b32.xlu0 %v1061_v9, %s3681_s19  ;;  %v1059_v28 = vmul.f32 %v3294_v27, %v3286_v0  ;;  %v3273_v27 = vld [vmem:[%s4589_s26 + $0x8] sm:$0xff]  }
 0x3aa   : > { %v1060_v31 = vpack.c.bf16 %v1059_v28, %v1059_v28  ;;  %v3274_v28 = vld [vmem:[%s4590_s14] sm:$0xff]  }
 0x3e9   : > { %v1064_v29 = vpop.permute.xlu1 %1063 }
 0x3ea   : > { %v1070_v30 = vsel %vm1068_vm4, %v1064_v29, 0 }
 0x3eb   : > { %2961 = vmatpush3.bf16.msra.mxu1 %v1070_v30 }
 0x3ec   : > { %2972 = vmatprep.subr.bf16.mxu1 %v3672_v4 }
 0x3ed   : > { %v1287_v39 = vpop.permute.xlu1 %1286 }
 0x3ee   : > { %2963 = vmatmul.mubr.msk.bf16.vlgmr.msra.gmra.mxu1 %vm1002_vm3, %v1060_v31  ;;  %v1292_v42 = vsel %vm1068_vm4, %v1287_v39, 0 }
 0x3ef   : > { %2974 = vmatprep.mubr.msk.bf16.mxu1 %vm3673_vm1, %v3672_v4 }
 0x3f1   : > { %v1397_v44 = vpop.permute.xlu1 %1396 }
 0x3f2   : > { %v1402_v47 = vsel %vm1068_vm4, %v1397_v44, 0 }
 0x40b   : > { %v1172_v32 = vpop.xlane.xlu0 %1171 }
 0x40c   : > { %3295 = vrcp.f32 %v1172_v32 }
 0x413   : > { %v1282_v33 = vpop.xlane.xlu0 %1281 }
 0x414   : > { %3297 = vrcp.f32 %v1282_v33  ;;  %v856_v33 = vld [vmem:[%s4080_s16] sm:$0xff] }
 0x419   : > { %v3296_v34 = vpop.eup %3295 }
 0x41a   : > { %v1174_v36 = vmul.f32 %v3296_v34, %v3288_v20  ;;  %v1465_v20 = vrot.slane %v4137_v13, %v1464_v19  ;;  %v857_v34 = vld [vmem:[%s4080_s16 + $0x8] sm:$0xf]  ;;  %s4591_s16 = smov %s4588_s22 }
 0x41b   : > { %v1392_v35 = vpop.xlane.xlu0 %1391 }
 0x41c   : > { %3299 = vrcp.f32 %v1392_v35  ;;  %v1175_v40 = vpack.c.bf16 %v1174_v36, %v1174_v36  ;;  %v1618_v35 = vpack.c.bf16 %v857_v34, %v856_v33  ;;  %v3275_v36 = vld [vmem:[%s4096_s3 + $0x8] sm:$0xff]  }
 0x41f   : > { %v1177_v37 = vpop.permute.xlu0 %1176 }
 0x420   : > { %v1182_v38 = vsel %vm1068_vm4, %v1177_v37, 0  ;;  %v3276_v37 = vld [vmem:[%s4096_s3] sm:$0xff]   ;;  %s4592_s3 = scalar_lea.vmem [#allocation8], %s4048_s17  ;;  %s4596_s17 = scalar_lea.vmem [#allocation12], %s4061_s5 }
 0x421   : > { %2973 = vmatpush3.bf16.msra.mxu1 %v1182_v38  ;;  %v3298_v41 = vpop.eup %3297  ;;  %s4593_s15 = smov %s4592_s3  ;;  %s4597_s5 = sld [smem:[#allocation26_spill]] }
 0x422   : > { %2984 = vmatprep.subr.bf16.mxu1 %v3672_v4  ;;  %v1284_v43 = vmul.f32 %v3298_v41, %v3290_v22  ;;  %v1538_v41 = vsub.s32 4, %v4132_v11 }
 0x424   : > { %2975 = vmatmul.mubr.msk.bf16.vlgmr.msra.gmra.mxu1 %vm1002_vm3, %v1175_v40  ;;  %v1285_v45 = vpack.c.bf16 %v1284_v43, %v1284_v43  ;;  %v1539_v43 = vrot.slane %v4137_v13, %v1538_v41 }
 0x425   : > { %2985 = vmatpush3.bf16.msra.mxu1 %v1292_v42  ;;  %2986 = vmatprep.mubr.msk.bf16.mxu1 %vm3673_vm1, %v3672_v4  ;;  %v1543_v42 = vsub.s32 5, %v4132_v11 }
 0x426   : > { %2996 = vmatprep.subr.bf16.mxu1 %v3672_v4 }
 0x427   : > { %p2858_p10 = scmp.ne.s32.totalorder %s4597_s5, 1 }
 0x428   : > { %s4598_s11 = sld [smem:[#allocation51_spill]] (!%p2858_p10) }
 0x429   : > { %v3300_v46 = vpop.eup %3299 }
 0x42a   : > { %v1394_v48 = vmul.f32 %v3300_v46, %v3292_v24  ;;  %v1544_v46 = vrot.slane %v4137_v13, %v1543_v42 }
 0x42c   : > { %2987 = vmatmul.mubr.msk.bf16.vlgmr.msra.gmra.mxu1 %vm1002_vm3, %v1285_v45  ;;  %v1395_v49 = vpack.c.bf16 %v1394_v48, %v1394_v48 }
 0x42d   : > { %2997 = vmatpush3.bf16.msra.mxu1 %v1402_v47  ;;  %2998 = vmatprep.mubr.msk.bf16.mxu1 %vm3673_vm1, %v3672_v4 }
 0x42e   : > { %3010 = vmatprep.subr.bf16.mxu1 %v3672_v4 }
 0x434   : > { %2999 = vmatmul.mubr.msk.bf16.vlgmr.msra.gmra.mxu1 %vm1002_vm3, %v1395_v49 }
 0x435   : > { %3014 = vmatprep.mubr.msk.bf16.mxu1 %vm3673_vm1, %v3672_v4  ;;  %3011 = vmatpush3.bf16.msra.mxu1 %v3275_v36 }
 0x436   : > { %3012 = vmatprep.subr.bf16.mxu1 %v3672_v4 }
 0x439   : > { %3013 = vmatpush3.bf16.msra.mxu1 %v3276_v37 }
 0x43a   : > { %3026 = vmatprep.subr.bf16.mxu1 %v3672_v4 }
 0x4ae   : > { %v1106_v50 = vpop.f32.mrf.mxu1 }
 0x4b0   : > { %v2964_v51 = vpop.f32.mrf.mxu1 }
 0x4b2   : > { %v1109_v53 = vpop.f32.mrf.mxu1 }
 0x4b4   : > { %v2965_v54 = vpop.f32.mrf.mxu1 }
 0x4e4   : > { %v1218_v56 = vpop.f32.mrf.mxu1 }
 0x4e5   : > { %1445 = vrot.lane.b32.xlu1 %v1218_v56, %s3682_s21 }
 0x4e6   : > { %v2976_v57 = vpop.f32.mrf.mxu1 }
 0x4e8   : > { %v1221_v59 = vpop.f32.mrf.mxu1 }
 0x4ea   : > { %v2977_v60 = vpop.f32.mrf.mxu1 }
 0x4ec   : > { %v1328_v61 = vpop.f32.mrf.mxu1 }
 0x4ed   : > { %1449 = vrot.lane.b32.xlu1 %v1328_v61, %s3683_s10  ;;  %v1561_v61 = vsub.s32 6, %v4132_v11 }
 0x4ee   : > { %v2988_v62 = vpop.f32.mrf.mxu1 }
 0x4ef   : > { %v1562_v62 = vrot.slane %v4137_v13, %v1561_v61 }
 0x4f0   : > { %v1331_v63 = vpop.f32.mrf.mxu1 }
 0x4f2   : > { %v2989_v0 = vpop.f32.mrf.mxu1 }
 0x4f4   : > { %v1438_v1 = vpop.f32.mrf.mxu1 }
 0x4f5   : > { %1453 = vrot.lane.b32.xlu1 %v1438_v1, %s3684_s9 }
 0x4f6   : > { %v3000_v2 = vpop.f32.mrf.mxu1 }
 0x4f8   : > { %v1441_v3 = vpop.f32.mrf.mxu1 }
 0x4fa   : > { %v3001_v5 = vpop.f32.mrf.mxu1 }
 0x557   : > { %v1446_v6 = vpop.permute.xlu1 %1445 }
 0x558   : > { %v1456_v9 = vsel %vm1002_vm3, %v1106_v50, %v1446_v6  ;;  %v1677_v50 = vsub.s32 7, %v4132_v11 }
 0x55a   : > { %v1678_v51 = vrot.slane %v4137_v13, %v1677_v50 }
 0x55f   : > { %v1450_v7 = vpop.permute.xlu1 %1449 }
 0x560   : > { %v1458_v10 = vsel %vm1457_vm5, %v1456_v9, %v1450_v7 }
 0x567   : > { %v1454_v15 = vpop.permute.xlu1 %1453 }
 0x568   : > { %v1460_v16 = vsel %vm1459_vm6, %v1458_v10, %v1454_v15 }
 0x569   : > { %v1461_v18 = vpack.c.bf16 %v1460_v16, %v1460_v16 }
 0x56b   : > { %3007 = vmatmul.mubr.msk.bf16.vlgmr.msra.gmra.mxu0 %vm890_vm2, %v1461_v18 }
 0x56c   : > { %3022 = vmatprep.mubr.msk.bf16.mxu0 %vm3673_vm1, %v3672_v4  ;;  %3019 = vmatpush3.bf16.msra.mxu0 %v3273_v27 }
 0x56d   : > { %3020 = vmatprep.subr.bf16.mxu0 %v3672_v4 }
 0x570   : > { %3021 = vmatpush3.bf16.msra.mxu0 %v3274_v28 }
 0x571   : > { %3032 = vmatprep.subr.bf16.mxu0 %v3672_v4 }
 0x573   : > { %3023 = vmatmul.mubr.msk.bf16.vlgmr.msra.gmra.mxu0 %vm890_vm2, %v1618_v35 }
 0x574   : > { %3034 = vmatprep.mubr.msk.bf16.mxu0 %vm3673_vm1, %v3672_v4 }
 0x62b   : > { %v1515_v21 = vpop.f32.mrf.mxu0 }
 0x62c   : > { %v1516_v17 = vadd.f32 %v1515_v21, %v1465_v20 }
 0x62d   : > { %v3008_v22 = vpop.f32.mrf.mxu0 }
 0x62e   : > { %v1521_v23 = vadd.f32 %v1516_v17, %v4118_v8 }
 0x62f   : > { %v1518_v24 = vpop.f32.mrf.mxu0 }
 0x630   : > { %v1522_v25 = vsel %vm890_vm2, %v1521_v23, 0.0 }
 0x631   : > { %1523 = vadd.xlane.f32.xlu0 %v1522_v25  ;;  %v3009_v26 = vpop.f32.mrf.mxu0 }
 0x633   : > { %v4266_v53 = vpop.f32.mrf.mxu0 }
 0x634   : > { %v1679_v55 = vadd.f32 %v1678_v51, %v4266_v53 }
 0x635   : > { %v3024_v54 = vpop.f32.mrf.mxu0 }
 0x637   : > { %v4269_v56 = vpop.f32.mrf.mxu0 }
 0x638   : > { %v1680_v57 = vadd.f32 %v1678_v51, %v4269_v56 }
 0x639   : > { %v3025_v58 = vpop.f32.mrf.mxu0 }
 0x63a   : > { %v1692_v59 = vpack.c.bf16 %v1680_v57, %v1679_v55 }
 0x63c   : > { %v1697_v60 = vsel %vm1002_vm3, %v1692_v59, 0 }
 0x647   : > { %1807 = vrot.lane.b32.xlu0 %v1692_v59, %s3675_s4 }
 0x64b   : > { %1917 = vrot.lane.b32.xlu0 %v1692_v59, %s3674_s23 }
 0x64f   : > { %2027 = vrot.lane.b32.xlu0 %v1692_v59, %s3676_s8 }
 0x6ba   : > { %v1524_v8 = vpop.xlane.xlu0 %1523 }
 0x6bb   : > { %v1526_v29 = vmul.f32 0.03125, %v1524_v8 }
 0x6bd   : > { %v1527_v30 = vsub.f32 %v1521_v23, %v1526_v29 }
 0x6be   : > { %v1808_v2 = vpop.permute.xlu0 %1807 }
 0x6bf   : > { %v1528_v31 = vmul.f32 %v1527_v30, %v1527_v30  ;;  %v1813_v5 = vsel %vm1002_vm3, %v1808_v2, 0 }
 0x6c1   : > { %v1529_v32 = vsel %vm890_vm2, %v1528_v31, 0.0 }
 0x6c2   : > { %1530 = vadd.xlane.f32.xlu1 %v1529_v32  ;;  %v1918_v13 = vpop.permute.xlu0 %1917  ;;  %v4307_v32 = vld [vmem:[%s4591_s16 + $0x8] sm:$0xff] }
 0x6c3   : > { %v1923_v10 = vsel %vm1002_vm3, %v1918_v13, 0  ;;  %v1684_v35 = vrot.slane %v4307_v32, %v4140_v14 }
 0x6c6   : > { %v2028_v15 = vpop.permute.xlu0 %2027 }
 0x6c7   : > { %v2033_v18 = vsel %vm1002_vm3, %v2028_v15, 0 }
 0x74b   : > { %v1531_v38 = vpop.xlane.xlu1 %1530 }
 0x74c   : > { %v1532_v39 = vmul.f32 0.03125, %v1531_v38 }
 0x74e   : > { %v1533_v40 = vadd.f32 1e-05, %v1532_v39 }
 0x750   : > { %3301 = vrsqrt.f32 %v1533_v40 }
 0x75d   : > { %v3302_v44 = vpop.eup %3301 }
 0x75e   : > { %v1535_v45 = vmul.f32 %v3302_v44, %v1527_v30 }
 0x760   : > { %v1540_v47 = vmul.f32 %v1539_v43, %v1535_v45 }
 0x762   : > { %v4257_v48 = vadd.f32 %v1544_v46, %v1540_v47 }
 0x764   : > { %v1558_v49 = vpack.c.bf16 %v4257_v48, %v4257_v48 }
 0x766   : > { %3015 = vmatmul.mubr.msk.bf16.vlgmr.msra.gmra.mxu1 %vm890_vm2, %v1558_v49 }
 0x767   : > { %3028 = vmatprep.mubr.msk.bf16.mxu1 %vm3673_vm1, %v3672_v4  ;;  %3027 = vmatpush3.bf16.xpose.msra.mxu1 %v1697_v60 }
 0x768   : > { %3038 = vmatprep.subr.bf16.mxu1 %v3672_v4 }
 0x826   : > { %v1612_v63 = vpop.f32.mrf.mxu1 }
 0x827   : > { %v1613_v0 = vadd.f32 %v1612_v63, %v1562_v62 }
 0x828   : > { %v3016_v1 = vpop.f32.mrf.mxu1 }
 0x829   : > { %v1691_v3 = vpack.c.bf16 %v1613_v0, %v1613_v0 }
 0x82a   : > { %v1615_v6 = vpop.f32.mrf.mxu1 }
 0x82b   : > { %1804 = vrot.lane.b32.xlu1 %v1691_v3, %s3675_s4  ;;  %3029 = vmatmul.mubr.msk.bf16.vlgmr.msra.gmra.mxu1 %vm1002_vm3, %v1691_v3 }
 0x82c   : > { %v3017_v7 = vpop.f32.mrf.mxu1  ;;  %3039 = vmatpush3.bf16.xpose.msra.mxu1 %v1813_v5  ;;  %3040 = vmatprep.mubr.msk.bf16.mxu1 %vm3673_vm1, %v3672_v4 }
 0x82d   : > { %3050 = vmatprep.subr.bf16.mxu1 %v3672_v4 }
 0x82f   : > { %1915 = vrot.lane.b32.xlu1 %v1691_v3, %s3674_s23 }
 0x833   : > { %2025 = vrot.lane.b32.xlu1 %v1691_v3, %s3676_s8 }
 0x89d   : > { %v1805_v9 = vpop.permute.xlu1 %1804 }
 0x89e   : > { %3041 = vmatmul.mubr.msk.bf16.vlgmr.msra.gmra.mxu1 %vm1002_vm3, %v1805_v9 }
 0x89f   : > { %3051 = vmatpush3.bf16.xpose.msra.mxu1 %v1923_v10  ;;  %3052 = vmatprep.mubr.msk.bf16.mxu1 %vm3673_vm1, %v3672_v4 }
 0x8a0   : > { %3062 = vmatprep.subr.bf16.mxu1 %v3672_v4 }
 0x8a1   : > { %v1916_v16 = vpop.permute.xlu1 %1915 }
 0x8a5   : > { %v2026_v20 = vpop.permute.xlu1 %2025 }
 0x8a6   : > { %3053 = vmatmul.mubr.msk.bf16.vlgmr.msra.gmra.mxu1 %vm1002_vm3, %v1916_v16 }
 0x8a7   : > { %3063 = vmatpush3.bf16.xpose.msra.mxu1 %v2033_v18  ;;  %3064 = vmatprep.mubr.msk.bf16.mxu1 %vm3673_vm1, %v3672_v4 }
 0x8a8   : > { %3074 = vmatprep.subr.bf16.mxu1 %v3672_v4 }
 0x8ae   : > { %3065 = vmatmul.mubr.msk.bf16.vlgmr.msra.gmra.mxu1 %vm1002_vm3, %v2026_v20 }
 0x8af   : > { %3078 = vmatprep.mubr.msk.bf16.mxu1 %vm3673_vm1, %v3672_v4 }
 0x8eb   : > { %v1733_v21 = vpop.f32.mrf.mxu1 }
 0x8ec   : > { %v1740_v17 = vsel %vm1739_vm7, %v1733_v21, -inf }
 0x8ed   : > { %1741 = vmax.xlane.f32.xlu0 %v1740_v17  ;;  %v3030_v22 = vpop.f32.mrf.mxu1 }
 0x8ef   : > { %v1736_v23 = vpop.f32.mrf.mxu1 }
 0x8f1   : > { %v3031_v24 = vpop.f32.mrf.mxu1 }
 0x95e   : > { %v1849_v25 = vpop.f32.mrf.mxu1 }
 0x95f   : > { %v1855_v26 = vsel %vm1739_vm7, %v1849_v25, -inf }
 0x960   : > { %1856 = vmax.xlane.f32.xlu1 %v1855_v26  ;;  %v3042_v27 = vpop.f32.mrf.mxu1 }
 0x962   : > { %v1852_v28 = vpop.f32.mrf.mxu1 }
 0x964   : > { %v3043_v8 = vpop.f32.mrf.mxu1 }
 0x966   : > { %v1959_v29 = vpop.f32.mrf.mxu1 }
 0x967   : > { %v1965_v30 = vsel %vm1739_vm7, %v1959_v29, -inf }
 0x968   : > { %1966 = vmax.xlane.f32.xlu0 %v1965_v30  ;;  %v3054_v31 = vpop.f32.mrf.mxu1 }
 0x96a   : > { %v1962_v33 = vpop.f32.mrf.mxu1 }
 0x96c   : > { %v3055_v34 = vpop.f32.mrf.mxu1 }
 0x96e   : > { %v2069_v36 = vpop.f32.mrf.mxu1 }
 0x96f   : > { %v2075_v37 = vsel %vm1739_vm7, %v2069_v36, -inf }
 0x970   : > { %2076 = vmax.xlane.f32.xlu0 %v2075_v37  ;;  %v3066_v38 = vpop.f32.mrf.mxu1 }
 0x971   : > { %1686 = vrot.lane.b32.xlu1 %v1684_v35, %s3677_s13 }
 0x972   : > { %v2072_v39 = vpop.f32.mrf.mxu1 }
 0x974   : > { %v3067_v40 = vpop.f32.mrf.mxu1 }
 0x975   : > { %v3277_v40 = vld [vmem:[%s4592_s3 + $0x8] sm:$0xff]  }
 0x976   : > { %v1742_v43 = vpop.xlane.xlu0 %1741  ;;  %3075 = vmatpush3.bf16.msra.mxu1 %v3277_v40 }
 0x977   : > { %v1743_v44 = vsub.f32 %v1733_v21, %v1742_v43  ;;  %3076 = vmatprep.subr.bf16.mxu1 %v3672_v4 }
 0x979   : > { %v1744_v45 = vmul.f32 1.442695, %v1743_v44 }
 0x97b   : > { %3303 = vpow2.f32 %v1744_v45  ;;  %v3278_v45 = vld [vmem:[%s4593_s15] sm:$0xff]  }
 0x97c   : > { %3077 = vmatpush3.bf16.msra.mxu1 %v3278_v45 }
 0x97d   : > { %3090 = vmatprep.subr.bf16.mxu1 %v3672_v4 }
 0x988   : > { %v3304_v46 = vpop.eup %3303 }
 0x989   : > { %v1746_v47 = vsel %vm1739_vm7, %v3304_v46, 0.0 }
 0x98a   : > { %1747 = vadd.xlane.f32.xlu0 %v1746_v47 }
 0x9e9   : > { %v1857_v49 = vpop.xlane.xlu1 %1856 }
 0x9ea   : > { %v1858_v50 = vsub.f32 %v1849_v25, %v1857_v49 }
 0x9ec   : > { %v1859_v51 = vmul.f32 1.442695, %v1858_v50 }
 0x9ed   : > { %v1687_v54 = vpop.permute.xlu1 %1686 }
 0x9ee   : > { %3305 = vpow2.f32 %v1859_v51  ;;  %v1689_v55 = vadd.f32 %v1687_v54, %v4266_v53  ;;  %v1690_v57 = vadd.f32 %v1687_v54, %v4269_v56 }
 0x9f0   : > { %v1752_v58 = vpack.c.bf16 %v1690_v57, %v1689_v55 }
 0x9f1   : > { %v1967_v59 = vpop.xlane.xlu0 %1966 }
 0x9f2   : > { %v1968_v60 = vsub.f32 %v1959_v29, %v1967_v59  ;;  %1754 = vrot.lane.b32.xlu1 %v1752_v58, %s3678_s25 }
 0x9f4   : > { %v1969_v62 = vmul.f32 1.442695, %v1968_v60 }
 0x9f6   : > { %3307 = vpow2.f32 %v1969_v62  ;;  %1977 = vrot.lane.b32.xlu1 %v1752_v58, %s3679_s12 }
 0x9f9   : > { %v2077_v63 = vpop.xlane.xlu0 %2076 }
 0x9fa   : > { %v2078_v0 = vsub.f32 %v2069_v36, %v2077_v63  ;;  %2087 = vrot.lane.b32.xlu1 %v1752_v58, %s3680_s30 }
 0x9fb   : > { %v3306_v1 = vpop.eup %3305 }
 0x9fc   : > { %v2079_v2 = vmul.f32 1.442695, %v2078_v0  ;;  %v1861_v3 = vsel %vm1739_vm7, %v3306_v1, 0.0 }
 0x9fd   : > { %1862 = vadd.xlane.f32.xlu0 %v1861_v3 }
 0x9fe   : > { %3309 = vpow2.f32 %v2079_v2 }
 0xa03   : > { %v3308_v53 = vpop.eup %3307 }
 0xa04   : > { %v1971_v56 = vsel %vm1739_vm7, %v3308_v53, 0.0 }
 0xa05   : > { %1972 = vadd.xlane.f32.xlu0 %v1971_v56 }
 0xa0b   : > { %v3310_v5 = vpop.eup %3309 }
 0xa0c   : > { %v2081_v6 = vsel %vm1739_vm7, %v3310_v5, 0.0 }
 0xa0d   : > { %2082 = vadd.xlane.f32.xlu0 %v2081_v6 }
 0xa13   : > { %v1748_v7 = vpop.xlane.xlu0 %1747 }
 0xa14   : > { %3311 = vrcp.f32 %v1748_v7 }
 0xa21   : > { %v3312_v13 = vpop.eup %3311 }
 0xa22   : > { %v1750_v9 = vmul.f32 %v3312_v13, %v3304_v46 }
 0xa23   : > { %1867 = vrot.lane.b32.xlu0 %v1752_v58, %s3681_s19 }
 0xa24   : > { %v1751_v16 = vpack.c.bf16 %v1750_v9, %v1750_v9 }
 0xa64   : > { %v1755_v10 = vpop.permute.xlu1 %1754 }
 0xa65   : > { %v1761_v15 = vsel %vm1759_vm8, %v1755_v10, 0 }
 0xa66   : > { %3033 = vmatpush3.bf16.msra.mxu0 %v1761_v15 }
 0xa67   : > { %3044 = vmatprep.subr.bf16.mxu0 %v3672_v4 }
 0xa68   : > { %v1978_v25 = vpop.permute.xlu1 %1977 }
 0xa69   : > { %3035 = vmatmul.mubr.msk.bf16.vlgmr.msra.gmra.mxu0 %vm1739_vm7, %v1751_v16  ;;  %v1983_v28 = vsel %vm1759_vm8, %v1978_v25, 0 }
 0xa6a   : > { %3046 = vmatprep.mubr.msk.bf16.mxu0 %vm3673_vm1, %v3672_v4 }
 0xa6c   : > { %v2088_v29 = vpop.permute.xlu1 %2087 }
 0xa6d   : > { %v2093_v33 = vsel %vm1759_vm8, %v2088_v29, 0 }
 0xa86   : > { %v1863_v18 = vpop.xlane.xlu0 %1862 }
 0xa87   : > { %3313 = vrcp.f32 %v1863_v18 }
 0xa8e   : > { %v1973_v20 = vpop.xlane.xlu0 %1972 }
 0xa8f   : > { %3315 = vrcp.f32 %v1973_v20 }
 0xa94   : > { %v3314_v21 = vpop.eup %3313 }
 0xa95   : > { %v1865_v22 = vmul.f32 %v3314_v21, %v3306_v1 }
 0xa96   : > { %v2083_v17 = vpop.xlane.xlu0 %2082 }
 0xa97   : > { %3317 = vrcp.f32 %v2083_v17  ;;  %v1866_v26 = vpack.c.bf16 %v1865_v22, %v1865_v22  ;;  %v3280_v17 = vld [vmem:[%s4595_s6] sm:$0xff]   ;;  %v3282_v22 = vld [vmem:[%s4101_s24 + $0x10] sm:$0xff]  }
 0xa9a   : > { %v1868_v23 = vpop.permute.xlu0 %1867 }
 0xa9b   : > { %v1873_v24 = vsel %vm1759_vm8, %v1868_v23, 0 }
 0xa9c   : > { %3045 = vmatpush3.bf16.msra.mxu0 %v1873_v24  ;;  %v3316_v27 = vpop.eup %3315 }
 0xa9d   : > { %3056 = vmatprep.subr.bf16.mxu0 %v3672_v4  ;;  %v1975_v8 = vmul.f32 %v3316_v27, %v3308_v53  ;;  %v2154_v53 = vrot.slane %v4307_v32, %v988_v12  ;;  %v3279_v12 = vld [vmem:[%s4594_s18 + $0x8] sm:$0xff]  }
 0xa9f   : > { %3047 = vmatmul.mubr.msk.bf16.vlgmr.msra.gmra.mxu0 %vm1739_vm7, %v1866_v26  ;;  %v1976_v30 = vpack.c.bf16 %v1975_v8, %v1975_v8  ;;  %v2227_v26 = vrot.slane %v4307_v32, %v993_v52 }
 0xaa0   : > { %3057 = vmatpush3.bf16.msra.mxu0 %v1983_v28  ;;  %3058 = vmatprep.mubr.msk.bf16.mxu0 %vm3673_vm1, %v3672_v4  ;;  %v2232_v28 = vrot.slane %v4307_v32, %v1464_v19 }
 0xaa1   : > { %3068 = vmatprep.subr.bf16.mxu0 %v3672_v4 }
 0xaa4   : > { %v3318_v31 = vpop.eup %3317 }
 0xaa5   : > { %v2085_v34 = vmul.f32 %v3318_v31, %v3310_v5 }
 0xaa7   : > { %3059 = vmatmul.mubr.msk.bf16.vlgmr.msra.gmra.mxu0 %vm1739_vm7, %v1976_v30  ;;  %v2086_v35 = vpack.c.bf16 %v2085_v34, %v2085_v34  ;;  %v3284_v34 = vld [vmem:[%s4101_s24] sm:$0xff]  }
 0xaa8   : > { %3069 = vmatpush3.bf16.msra.mxu0 %v2093_v33  ;;  %3070 = vmatprep.mubr.msk.bf16.mxu0 %vm3673_vm1, %v3672_v4  ;;  %v3283_v33 = vld [vmem:[%s4101_s24 + $0x8] sm:$0xff]  }
 0xaa9   : > { %3082 = vmatprep.subr.bf16.mxu0 %v3672_v4 }
 0xaaf   : > { %3071 = vmatmul.mubr.msk.bf16.vlgmr.msra.gmra.mxu0 %vm1739_vm7, %v2086_v35  ;;  %v860_v35 = vld [vmem:[%s4596_s17] sm:$0xff] }
 0xab0   : > { %3086 = vmatprep.mubr.msk.bf16.mxu0 %vm3673_vm1, %v3672_v4  ;;  %3083 = vmatpush3.bf16.msra.mxu0 %v3279_v12  ;;  %v2242_v52 = vrot.slane %v860_v35, %v4140_v14 }
 0xab1   : > { %3084 = vmatprep.subr.bf16.mxu0 %v3672_v4 }
 0xab4   : > { %3085 = vmatpush3.bf16.msra.mxu0 %v3280_v17 }
 0xb29   : > { %v1797_v36 = vpop.f32.mrf.mxu0 }
 0xb2b   : > { %v3036_v37 = vpop.f32.mrf.mxu0 }
 0xb2d   : > { %v1800_v38 = vpop.f32.mrf.mxu0 }
 0xb2f   : > { %v3037_v39 = vpop.f32.mrf.mxu0 }
 0xb5f   : > { %v1909_v43 = vpop.f32.mrf.mxu0 }
 0xb60   : > { %2136 = vrot.lane.b32.xlu1 %v1909_v43, %s3682_s21 }
 0xb61   : > { %v3048_v44 = vpop.f32.mrf.mxu0 }
 0xb62   : > { %v2311_v44 = vrot.slane %v4307_v32, %v1538_v41  ;;  %v2397_v41 = vrot.slane %v4307_v32, %v1543_v42 }
 0xb63   : > { %v1912_v46 = vpop.f32.mrf.mxu0 }
 0xb65   : > { %v3049_v47 = vpop.f32.mrf.mxu0 }
 0xb67   : > { %v2019_v49 = vpop.f32.mrf.mxu0 }
 0xb68   : > { %2140 = vrot.lane.b32.xlu1 %v2019_v49, %s3683_s10 }
 0xb69   : > { %v3060_v50 = vpop.f32.mrf.mxu0 }
 0xb6b   : > { %v2022_v51 = vpop.f32.mrf.mxu0 }
 0xb6d   : > { %v3061_v54 = vpop.f32.mrf.mxu0 }
 0xb6f   : > { %v2129_v55 = vpop.f32.mrf.mxu0 }
 0xb70   : > { %2144 = vrot.lane.b32.xlu1 %v2129_v55, %s3684_s9 }
 0xb71   : > { %v3072_v57 = vpop.f32.mrf.mxu0 }
 0xb73   : > { %v2132_v58 = vpop.f32.mrf.mxu0 }
 0xb75   : > { %v3073_v59 = vpop.f32.mrf.mxu0 }
 0xbd2   : > { %v2137_v60 = vpop.permute.xlu1 %2136 }
 0xbd3   : > { %v2147_v63 = vsel %vm1002_vm3, %v1797_v36, %v2137_v60 }
 0xbda   : > { %v2141_v62 = vpop.permute.xlu1 %2140 }
 0xbdb   : > { %v2148_v0 = vsel %vm1457_vm5, %v2147_v63, %v2141_v62 }
 0xbe2   : > { %v2145_v1 = vpop.permute.xlu1 %2144 }
 0xbe3   : > { %v2149_v2 = vsel %vm1459_vm6, %v2148_v0, %v2145_v1  ;;  %v2402_v0 = vrot.slane %v4307_v32, %v1561_v61 }
 0xbe4   : > { %v2150_v3 = vpack.c.bf16 %v2149_v2, %v2149_v2 }
 0xbe6   : > { %3079 = vmatmul.mubr.msk.bf16.vlgmr.msra.gmra.mxu1 %vm890_vm2, %v2150_v3 }
 0xbe7   : > { %3098 = vmatprep.mubr.msk.bf16.mxu1 %vm3673_vm1, %v3672_v4 }
 0xca6   : > { %v2204_v56 = vpop.f32.mrf.mxu1 }
 0xca7   : > { %v2205_v5 = vadd.f32 %v2204_v56, %v2154_v53 }
 0xca8   : > { %v3080_v6 = vpop.f32.mrf.mxu1 }
 0xca9   : > { %v2210_v7 = vadd.f32 %v2205_v5, %v4257_v48  ;;  %v3281_v48 = vld [vmem:[%s4101_s24 + $0x18] sm:$0xff]  }
 0xcaa   : > { %v2207_v13 = vpop.f32.mrf.mxu1  ;;  %3091 = vmatpush3.bf16.msra.mxu1 %v3281_v48 }
 0xcab   : > { %v2211_v9 = vsel %vm890_vm2, %v2210_v7, 0.0  ;;  %3092 = vmatprep.subr.bf16.mxu1 %v3672_v4 }
 0xcac   : > { %2212 = vadd.xlane.f32.xlu0 %v2211_v9  ;;  %v3081_v10 = vpop.f32.mrf.mxu1 }
 0xcae   : > { %3093 = vmatpush3.bf16.msra.mxu1 %v3282_v22 }
 0xcaf   : > { %3094 = vmatprep.subr.bf16.mxu1 %v3672_v4 }
 0xcb2   : > { %3095 = vmatpush3.bf16.msra.mxu1 %v3283_v33 }
 0xcb3   : > { %3096 = vmatprep.subr.bf16.mxu1 %v3672_v4 }
 0xcb6   : > { %3097 = vmatpush3.bf16.msra.mxu1 %v3284_v34 }
 0xd35   : > { %v2213_v15 = vpop.xlane.xlu0 %2212 }
 0xd36   : > { %v2214_v16 = vmul.f32 0.03125, %v2213_v15 }
 0xd38   : > { %v2215_v18 = vsub.f32 %v2210_v7, %v2214_v16 }
 0xd3a   : > { %v2216_v20 = vmul.f32 %v2215_v18, %v2215_v18 }
 0xd3c   : > { %v2217_v21 = vsel %vm890_vm2, %v2216_v20, 0.0 }
 0xd3d   : > { %2218 = vadd.xlane.f32.xlu1 %v2217_v21 }
 0xdc6   : > { %v2219_v23 = vpop.xlane.xlu1 %2218 }
 0xdc7   : > { %v2220_v24 = vmul.f32 0.03125, %v2219_v23 }
 0xdc9   : > { %v2221_v25 = vadd.f32 1e-05, %v2220_v24 }
 0xdcb   : > { %3319 = vrsqrt.f32 %v2221_v25 }
 0xdd8   : > { %v3320_v27 = vpop.eup %3319 }
 0xdd9   : > { %v2223_v8 = vmul.f32 %v3320_v27, %v2215_v18 }
 0xddb   : > { %v2228_v29 = vmul.f32 %v2227_v26, %v2223_v8 }
 0xddd   : > { %v2233_v30 = vadd.f32 %v2232_v28, %v2228_v29 }
 0xddf   : > { %v2238_v31 = vpack.c.bf16 %v2233_v30, %v2233_v30 }
 0xde1   : > { %3087 = vmatmul.mubr.msk.bf16.vlgmr.msra.gmra.mxu0 %vm890_vm2, %v2238_v31 }
 0xea1   : > { %v2292_v36 = vpop.f32.mrf.mxu0 }
 0xea2   : > { %v2293_v37 = vadd.f32 %v2292_v36, %v2242_v52 }
 0xea3   : > { %v3088_v38 = vpop.f32.mrf.mxu0 }
 0xea4   : > { %v2298_v19 = vmax.f32 %v2293_v37, 0.0 }
 0xea5   : > { %v2295_v39 = vpop.f32.mrf.mxu0 }
 0xea6   : > { %v2307_v40 = vpack.c.bf16 %v2298_v19, %v2298_v19 }
 0xea7   : > { %v3089_v43 = vpop.f32.mrf.mxu0 }
 0xea8   : > { %3099 = vmatmul.mubr.msk.bf16.vlgmr.msra.gmra.mxu1 %vm2336_vm9, %v2307_v40 }
 0xf68   : > { %v2374_v4 = vpop.f32.mrf.mxu1 }
 0xf69   : > { %v2375_v45 = vadd.f32 %v2374_v4, %v2311_v44 }
 0xf6a   : > { %v3100_v46 = vpop.f32.mrf.mxu1 }
 0xf6b   : > { %v2380_v47 = vadd.f32 %v2375_v45, %v2233_v30 }
 0xf6c   : > { %v2377_v49 = vpop.f32.mrf.mxu1 }
 0xf6d   : > { %v2381_v14 = vsel %vm890_vm2, %v2380_v47, 0.0 }
 0xf6e   : > { %2382 = vadd.xlane.f32.xlu0 %v2381_v14  ;;  %v3101_v50 = vpop.f32.mrf.mxu1 }
 0xff7   : > { %v2383_v51 = vpop.xlane.xlu0 %2382 }
 0xff8   : > { %v2384_v54 = vmul.f32 0.03125, %v2383_v51 }
 0xffa   : > { %v2385_v55 = vsub.f32 %v2380_v47, %v2384_v54 }
 0xffc   : > { %v2386_v57 = vmul.f32 %v2385_v55, %v2385_v55 }
 0xffe   : > { %v2387_v58 = vsel %vm890_vm2, %v2386_v57, 0.0 }
 0xfff   : > { %2388 = vadd.xlane.f32.xlu0 %v2387_v58 }
0x1088   : > { %v2389_v59 = vpop.xlane.xlu0 %2388 }
0x1089   : > { %v2390_v60 = vmul.f32 0.03125, %v2389_v59 }
0x108b   : > { %v2391_v62 = vadd.f32 1e-05, %v2390_v60 }
0x108d   : > { %3321 = vrsqrt.f32 %v2391_v62 }
0x109a   : > { %v3322_v63 = vpop.eup %3321 }
0x109b   : > { %v2393_v1 = vmul.f32 %v3322_v63, %v2385_v55 }
0x109d   : > { %v2398_v2 = vmul.f32 %v2397_v41, %v2393_v1  ;;  %2408 = sbr.rel (%p2858_p10) target bundleno = 4775 (0x12a7), region = 116 }
0x109f   : > { %v2403_v3 = vadd.f32 %v2402_v0, %v2398_v2 }
0x10a1   : > { %2404 = vst.msk [vmem:[#allocation2] sm:$0xff] %vm890_vm2, %v2403_v3 }
0x10a2   : > { %v3323_v53 = vld [vmem:[%s4598_s11 + $0x8] sm:$0xff]   ;;  %v3685_v56 = vmov 0.0   ;;  %v3324_v11 = vld [vmem:[%s4598_s11] sm:$0xff]   ;;  %vm3686_vm10 = vmmov 0   ;;  %v2413_v42 = vpack.c.bf16 %v2403_v3, %v2403_v3 }
0x10a3   : > { %3102 = vmatprep.subr.bf16.mxu0 %v3685_v56  ;;  %3106 = vmatprep.mubr.msk.bf16.mxu0 %vm3686_vm10, %v3685_v56  ;;  %v2859_v61 = vld [vmem:[#allocation14] ss:$0 sm:$0xff] }
0x10a4   : > { %3103 = vmatpush3.bf16.msra.mxu0 %v3323_v53 }
0x10a5   : > { %3104 = vmatprep.subr.bf16.mxu0 %v3685_v56 }
0x10a8   : > { %3105 = vmatpush3.bf16.msra.mxu0 %v3324_v11 }
0x10ab   : > { %3107 = vmatmul.mubr.msk.bf16.vlgmr.msra.gmra.mxu0 %vm890_vm2, %v2413_v42 }
0x116b   : > { %v2470_v32 = vpop.f32.mrf.mxu0 }
0x116c   : > { %v2471_v5 = vadd.f32 %v2859_v61, %v2470_v32 }
0x116d   : > { %v3108_v6 = vpop.f32.mrf.mxu0 }
0x116e   : > { %v2476_v7 = vsel %vm890_vm2, %v2471_v5, -inf }
0x116f   : > { %2477 = vmax.xlane.f32.xlu0 %v2476_v7  ;;  %v2473_v13 = vpop.f32.mrf.mxu0 }
0x1171   : > { %v3109_v9 = vpop.f32.mrf.mxu0 }
0x11f8   : > { %v2478_v10 = vpop.xlane.xlu0 %2477 }
0x11f9   : > { %v2479_v15 = vsub.f32 %v2471_v5, %v2478_v10 }
0x11fb   : > { %v2480_v16 = vmul.f32 1.442695, %v2479_v15 }
0x11fd   : > { %3325 = vpow2.f32 %v2480_v16 }
0x120a   : > { %v3326_v18 = vpop.eup %3325 }
0x120b   : > { %v2482_v20 = vsel %vm890_vm2, %v3326_v18, 0.0 }
0x120c   : > { %2483 = vadd.xlane.f32.xlu0 %v2482_v20 }
0x1295   : > { %v2484_v21 = vpop.xlane.xlu0 %2483 }
0x1296   : > { %3327 = vrcp.f32 %v2484_v21 }
0x12a3   : > { %v3328_v12 = vpop.eup %3327 }
0x12a4   : > { %v2486_v17 = vmul.f32 %v3328_v12, %v3326_v18 }
0x12a6   : > { %2487 = vst.msk [vmem:[%s4105_s29] sm:$0xff] %vm890_vm2, %v2486_v17 }
0x12a7 PF: > { %s4599_s22 = sld [smem:[#allocation27_spill]]  ;;  %s2502_s19 = sshll.u32 %s4105_s29, 4  ;;  %s2503_s19 = int_to_ptr.vmem [resolvable:$true] %s2502_s19 }
0x12a8   : > { %s4600_s23 = sld [smem:[#allocation35_spill]]  ;;  %s2489_s21 = scalar_lea.sflag [#allocation5], %s4034_s2 }
0x12a9   : > { %s4601_s25 = sld [smem:[#allocation53_spill]]  ;;  %s3523_s10 = scalar_lea.vmem %s2503_s19, 128 }
0x12aa   : > { %p3524_p1 = scmp.ne.s32.totalorder %s2503_s19, %s3523_s10  ;;  %s3687_s9 = smov [#allocation15]  }
0x12ab   : > { %s3527_s26 = sshll.u32 %s3687_s9, 4  ;;  %s3528_s26 = int_to_ptr.vmem [resolvable:$false] %s3527_s26 }
0x12ac   : > { %s3529_s14 = scalar_lea.vmem %s3528_s26, 256  ;;  %p3530_p4 = scmp.lt.s32.totalorder %s2503_s19, %s3528_s26 }
0x12ad   : > { %s2864_s4 = sshll.u32 %s4599_s22, 7  ;;  %p3531_p3 = scmp.lt.s32.totalorder %s3529_s14, %s3523_s10 }
0x12ae   : > { %p4603_p12 = scmp.ne.s32.totalorder %s4600_s23, 0 }
0x12af   : > { %s4602_s12 = smov %s4601_s25  ;;  %s2500_s30 = scalar_lea.hbm %s4601_s25, %s2864_s4 }
0x12b0   : > { %p3525_p11 = pnand %p3524_p1, %p4603_p12  ;;  %p3532_p0 = por %p3531_p3, %p3530_p4 }
0x12b2   : > { %p3526_p8 = pneg %p3525_p11 }
0x12b4   : > { %p3533_p13 = pnand %p3532_p0, %p3526_p8 }
0x12b6   : > { %3536 = shalt.err (!%p3533_p13)
}
0x12b7   : > { %s3537_s16 = scalar_lea.hbm %s2500_s30, 128  ;;  %s3541_s3 = scalar_lea.hbm %s4602_s12, 256 }
0x12b8   : > { %p3538_p5 = scmp.ne.s32.totalorder %s2500_s30, %s3537_s16  ;;  %p3542_p9 = scmp.lt.s32.totalorder %s2500_s30, %s4602_s12 }
0x12b9   : > { %p3543_p7 = scmp.lt.s32.totalorder %s3541_s3, %s3537_s16 }
0x12ba   : > { %p3539_p2 = pnand %p3538_p5, %p4603_p12 }
0x12bb   : > { %p3544_p10 = por %p3543_p7, %p3542_p9 }
0x12bc   : > { %p3540_p6 = pneg %p3539_p2 }
0x12be   : > { %p3545_p1 = pnand %p3544_p10, %p3540_p6 }
0x12c0   : > { %3548 = shalt.err (!%p3545_p1)
}
0x12c1   : > { %3126 = dma.vmem_to_hbm [thread:$0]  (%p4603_p12), %s2503_s19, 128, %s2500_s30, %s2489_s21  }
0x12c2 PF: > { %s4604_s6 = sld [smem:[#allocation23_spill]]  ;;  %p3158_p11 = scmp.ge.s32.totalorder %s3659_s28, 2 }
0x12c3   : > { %s4605_s17 = sld [smem:[#allocation32_spill]] }
0x12c8   : > { %s2514_s5 = sand.u32 1, %s4604_s6  }
0x12c9   : > { %p4606_p8 = scmp.ne.s32.totalorder %s4605_s17, 0  ;;  %s2515_s24 = scalar_lea.sflag [#allocation5], %s2514_s5 }
0x12cb   : > { %p3152_p4 = pnand %p3158_p11, %p4606_p8 }
0x12cd   : > { %p3153_p3 = pneg %p3152_p4 }
0x12cf   : > { %3614 = dma.done.wait (%p3153_p3), %s2515_s24, 128  }
0x12d0   : > { %3616 = vsyncadd (%p3153_p3), %s2515_s24, 4294967168  ;;  %s40_s28 = sadd.s32 1, %s3659_s28   ;;  %s4607_s18 = sld [smem:[#allocation22_spill]] }
0x12d1   : > { %p37_p0 = scmp.ge.s32.totalorder %s40_s28, 6   ;;  %s4608_s21 = sld [smem:[#allocation24_spill]] }
0x12d2   : > { %s4609_s22 = sld [smem:[#allocation25_spill]]  ;;  %s4615_s19 = smov %s3627_s20 }
0x12d3   : > { %s4610_s23 = sld [smem:[#allocation37_spill]]  ;;  %s4616_s20 = smov %s3961_s1 }
0x12d4   : > { %s4611_s24 = sld [smem:[#allocation28_spill]]  ;;  %39 = sbr.rel (!%p37_p0) target bundleno = 32 (0x20), region = 216 }
0x12d5   : > { %s4612_s25 = sld [smem:[#allocation29_spill]] }
0x12d6   : > { %s4613_s26 = sld [smem:[#allocation34_spill]] }
0x12d7   : > { %s4614_s27 = sld [smem:[#allocation36_spill]] }
0x12d9   :  { %2520 = vsyncpa [#allocation4], 1 }
0x12da   :  { %2522 = vsyncpa [#allocation4 + $0x1], 1 }
0x12db   :  { %2523 = vsyncpa [#allocation7], 1 }
0x12dc   :  { %2525 = vsyncpa [#allocation7 + $0x1], 1 }
0x12dd   :  { %2526 = vsyncpa [#allocation10], 1 }
0x12de   :  { %2528 = vsyncpa [#allocation10 + $0x1], 1 }
0x12df   :  { %2529 = vsyncpa [#allocation13], 1 }
0x12e0   :  { %2531 = vsyncpa [#allocation13 + $0x1], 1 }
0x12e1   :  { %2532 = vsyncpa [#allocation5], 1 }
0x12e2   :  { %2534 = vsyncpa [#allocation5 + $0x1], 1 }

</bundles_post_ra>
